<compile_context>
chip_gen: v7x
topology: tpu7x:2x2x1
jax: 0.10.0
libtpu: 0.0.40
codegen_flags: <defaults>
</compile_context>

<pallas_src>
import functools

import jax
import jax.numpy as jnp
from jax.experimental import pallas as pl
from jax.experimental.pallas import tpu as pltpu


# -----------------------------------------------------------------------------
# Pallas kernel: full encoder + decoder recurrence.
# Gate order in the fused 3H axis is (r, z, n), matching PyTorch GRU.
# -----------------------------------------------------------------------------
def seq2seq_kernel(
    x_ref,                 # [S*B, D]  time-major flattened encoder input
    e_wi, e_wh,            # [D, 3H], [H, 3H]   fused encoder gate weights
    e_b, e_bhn,            # [1, 3H] (bi, with bh folded for r/z), [1, H] (bh_n)
    d_wi, d_wh,            # [H, 3H], [H, 3H]   fused decoder gate weights
    d_b, d_bhn,            # [1, 3H], [1, H]
    fc_w, fc_b,            # [H, O], [1, O]
    out_ref,               # [T*B, O]  time-major flattened decoder output
    *, S, B, T,
):
    H = e_wh.shape[0]

    def gru_step(gi, gh, h, bhn):
        # gi already contains bi (and bh for the r/z gates).
        rz = jax.nn.sigmoid(gi[:, :2 * H] + gh[:, :2 * H])
        r = rz[:, :H]
        z = rz[:, H:]
        n = jnp.tanh(gi[:, 2 * H:] + r * (gh[:, 2 * H:] + bhn))
        return (1.0 - z) * n + z * h

    # ---- encoder -------------------------------------------------------------
    # Input-side projection hoisted off the sequential chain: one big matmul
    # over all S timesteps at once instead of S tiny ones.
    xp = (jnp.dot(x_ref[...], e_wi[...], preferred_element_type=jnp.float32)
          + e_b[...])                                              # [S*B, 3H]

    e_wh_v = e_wh[...]
    e_bhn_v = e_bhn[...]
    h = jnp.zeros((B, H), jnp.float32)
    for t in range(S):                      # static unroll (S small & fixed)
        gi = xp[t * B:(t + 1) * B]                                 # [B, 3H]
        gh = jnp.dot(h, e_wh_v, preferred_element_type=jnp.float32)
        h = gru_step(gi, gh, h, e_bhn_v)
    context = h                                                    # [B, H]

    # ---- decoder -------------------------------------------------------------
    # Decoder input is the constant context vector, so its input-side
    # projection is loop-invariant: compute it once.
    ci = (jnp.dot(context, d_wi[...], preferred_element_type=jnp.float32)
          + d_b[...])                                              # [B, 3H]

    d_wh_v = d_wh[...]
    d_bhn_v = d_bhn[...]
    h = context
    hs = []
    for _ in range(T):                      # static unroll (T small & fixed)
        gh = jnp.dot(h, d_wh_v, preferred_element_type=jnp.float32)
        h = gru_step(ci, gh, h, d_bhn_v)
        hs.append(h)

    # Batched FC head: one [T*B, H] x [H, O] matmul + a single store.
    h_all = jnp.concatenate(hs, axis=0)                            # [T*B, H]
    out_ref[...] = (jnp.dot(h_all, fc_w[...],
                            preferred_element_type=jnp.float32) + fc_b[...])


# -----------------------------------------------------------------------------
# Wrapper: pack per-gate params into fused layout, call the kernel.
# -----------------------------------------------------------------------------
@functools.partial(jax.jit, static_argnames=("out_seq",))
def seq2seq_pallas(x, params, *, out_seq):
    """x: [B, S, D] float32 -> [B, out_seq, O] float32."""
    B, S, D = x.shape
    O = params["fc_w"].shape[-1]

    def fuse_w(w):               # [3, Din, H] -> [Din, 3H]   (r|z|n)
        return jnp.concatenate([w[0], w[1], w[2]], axis=1)

    def fuse_b(bi, bh):          # -> ([1, 3H] with bh folded for r,z ; [1, H] bh_n)
        return (jnp.concatenate([bi[0] + bh[0], bi[1] + bh[1], bi[2]], axis=1),
                bh[2])

    e_wi = fuse_w(params["e_wi"])
    e_wh = fuse_w(params["e_wh"])
    e_b, e_bhn = fuse_b(params["e_bi"], params["e_bh"])
    d_wi = fuse_w(params["d_wi"])
    d_wh = fuse_w(params["d_wh"])
    d_b, d_bhn = fuse_b(params["d_bi"], params["d_bh"])

    # Time-major, flattened to [S*B, D] so the encoder input projection is a
    # single lane-dense matmul inside the kernel (no in-kernel reshape needed).
    x_tm = jnp.transpose(x, (1, 0, 2)).reshape(S * B, D)

    args = (x_tm, e_wi, e_wh, e_b, e_bhn, d_wi, d_wh, d_b, d_bhn,
            params["fc_w"], params["fc_b"])

    vmem = pl.BlockSpec(memory_space=pltpu.MemorySpace.VMEM)
    out_flat = pl.pallas_call(
        functools.partial(seq2seq_kernel, S=S, B=B, T=out_seq),
        out_shape=jax.ShapeDtypeStruct((out_seq * B, O), jnp.float32),
        in_specs=[vmem] * len(args),
        out_specs=vmem,
    )(*args)

    # TODO(synk): for large B on v7x, add a leading grid axis over batch with
    # dimension_semantics=("parallel",) to use both TensorCores.
    return jnp.transpose(out_flat.reshape(out_seq, B, O), (1, 0, 2))


# -----------------------------------------------------------------------------
# Deterministic parameter init (PyTorch-style uniform(-1/sqrt(H), 1/sqrt(H)))
# -----------------------------------------------------------------------------
def init_params(key, input_dim, hidden, output_dim):
    bound = 1.0 / jnp.sqrt(hidden)
    keys = jax.random.split(key, 10)

    def u(k, shape):
        return jax.random.uniform(k, shape, jnp.float32, -bound, bound)

    return {
        # encoder GRU (input_dim -> hidden), gate order (r, z, n)
        "e_wi": u(keys[0], (3, input_dim, hidden)),
        "e_wh": u(keys[1], (3, hidden, hidden)),
        "e_bi": u(keys[2], (3, 1, hidden)),
        "e_bh": u(keys[3], (3, 1, hidden)),
        # decoder GRU (hidden -> hidden), input is the context vector
        "d_wi": u(keys[4], (3, hidden, hidden)),
        "d_wh": u(keys[5], (3, hidden, hidden)),
        "d_bi": u(keys[6], (3, 1, hidden)),
        "d_bh": u(keys[7], (3, 1, hidden)),
        # output projection
        "fc_w": u(keys[8], (hidden, output_dim)),
        "fc_b": u(keys[9], (1, output_dim)),
    }


# -----------------------------------------------------------------------------
# Pure-JAX reference (per-gate math) for a correctness check
# -----------------------------------------------------------------------------
def seq2seq_ref(x, params, out_seq):
    def gru(x_t, h, wi, wh, bi, bh):
        r = jax.nn.sigmoid(x_t @ wi[0] + bi[0] + h @ wh[0] + bh[0])
        z = jax.nn.sigmoid(x_t @ wi[1] + bi[1] + h @ wh[1] + bh[1])
        n = jnp.tanh(x_t @ wi[2] + bi[2] + r * (h @ wh[2] + bh[2]))
        return (1.0 - z) * n + z * h

    B, S, D = x.shape
    H = params["e_wh"].shape[-1]
    h = jnp.zeros((B, H), jnp.float32)
    for t in range(S):
        h = gru(x[:, t, :], h, params["e_wi"], params["e_wh"],
                params["e_bi"], params["e_bh"])
    context = h

    outs = []
    h = context
    for _ in range(out_seq):
        h = gru(context, h, params["d_wi"], params["d_wh"],
                params["d_bi"], params["d_bh"])
        outs.append(h @ params["fc_w"] + params["fc_b"])
    return jnp.stack(outs, axis=1)


if __name__ == "__main__":
    B, S, D = 8, 8, 4        # batch, input seq len, input features
    H = 32                   # hidden size
    T, O = 8, 4              # output seq len, output features

    key = jax.random.PRNGKey(0)
    k_x, k_p = jax.random.split(key)
    x = jax.random.normal(k_x, (B, S, D), jnp.float32)
    params = init_params(k_p, D, H, O)

    out = seq2seq_pallas(x, params, out_seq=T)
    out = jax.block_until_ready(out)

    ref = seq2seq_ref(x, params, T)
    assert out.shape == (B, T, O), out.shape
    assert jnp.allclose(out, ref, rtol=1e-4, atol=1e-4), \
        float(jnp.max(jnp.abs(out - ref)))

    print("KERNEL_OK")
</pallas_src>

<mosaic_0001>
module attributes {stable_mosaic.version = 11 : i64} {
  func.func @seq2seq_kernel(%arg0: memref<64x4xf32, #tpu.memory_space<vmem>>, %arg1: memref<4x96xf32, #tpu.memory_space<vmem>>, %arg2: memref<32x96xf32, #tpu.memory_space<vmem>>, %arg3: memref<1x96xf32, #tpu.memory_space<vmem>>, %arg4: memref<1x32xf32, #tpu.memory_space<vmem>>, %arg5: memref<32x96xf32, #tpu.memory_space<vmem>>, %arg6: memref<32x96xf32, #tpu.memory_space<vmem>>, %arg7: memref<1x96xf32, #tpu.memory_space<vmem>>, %arg8: memref<1x32xf32, #tpu.memory_space<vmem>>, %arg9: memref<32x4xf32, #tpu.memory_space<vmem>>, %arg10: memref<1x4xf32, #tpu.memory_space<vmem>>, %arg11: memref<64x4xf32, #tpu.memory_space<vmem>>) attributes {dimension_semantics = [], scalar_prefetch = 0 : i64, scratch_operands = 0 : i64, tpu.core_type = #tpu.core_type<tc>} {
    %c0 = arith.constant 0 : index
    %c0_0 = arith.constant 0 : index
    %0 = vector.load %arg0[%c0, %c0_0] : memref<64x4xf32, #tpu.memory_space<vmem>>, vector<64x4xf32>
    %c0_1 = arith.constant 0 : index
    %c0_2 = arith.constant 0 : index
    %1 = vector.load %arg1[%c0_1, %c0_2] : memref<4x96xf32, #tpu.memory_space<vmem>>, vector<4x96xf32>
    %cst = arith.constant dense<0.000000e+00> : vector<64x96xf32>
    %2 = tpu.matmul %0, %1, %cst {dimension_numbers = #tpu.dot_dimension_numbers<[1], [0], [0], [1], [0, 0, 1, 1], [], []>} : vector<64x4xf32>, vector<4x96xf32>, vector<64x96xf32> -> vector<64x96xf32>
    %c0_3 = arith.constant 0 : index
    %c0_4 = arith.constant 0 : index
    %3 = vector.load %arg3[%c0_3, %c0_4] : memref<1x96xf32, #tpu.memory_space<vmem>>, vector<1x96xf32>
    %4 = vector.broadcast %3 : vector<1x96xf32> to vector<64x96xf32>
    %5 = arith.addf %2, %4 : vector<64x96xf32>
    %c0_5 = arith.constant 0 : index
    %c0_6 = arith.constant 0 : index
    %6 = vector.load %arg2[%c0_5, %c0_6] : memref<32x96xf32, #tpu.memory_space<vmem>>, vector<32x96xf32>
    %c0_7 = arith.constant 0 : index
    %c0_8 = arith.constant 0 : index
    %7 = vector.load %arg4[%c0_7, %c0_8] : memref<1x32xf32, #tpu.memory_space<vmem>>, vector<1x32xf32>
    %cst_9 = arith.constant 0.000000e+00 : f32
    %8 = vector.broadcast %cst_9 : f32 to vector<8x32xf32>
    %9 = vector.extract_strided_slice %5 {offsets = [0, 0], sizes = [8, 96], strides = [1, 1]} : vector<64x96xf32> to vector<8x96xf32>
    %cst_10 = arith.constant dense<0.000000e+00> : vector<8x96xf32>
    %10 = tpu.matmul %8, %6, %cst_10 {dimension_numbers = #tpu.dot_dimension_numbers<[1], [0], [0], [1], [0, 0, 1, 1], [], []>} : vector<8x32xf32>, vector<32x96xf32>, vector<8x96xf32> -> vector<8x96xf32>
    %11 = vector.extract_strided_slice %9 {offsets = [0, 0], sizes = [8, 64], strides = [1, 1]} : vector<8x96xf32> to vector<8x64xf32>
    %12 = vector.extract_strided_slice %10 {offsets = [0, 0], sizes = [8, 64], strides = [1, 1]} : vector<8x96xf32> to vector<8x64xf32>
    %13 = arith.addf %11, %12 : vector<8x64xf32>
    %14 = arith.negf %13 : vector<8x64xf32>
    %15 = math.exp %14 : vector<8x64xf32>
    %cst_11 = arith.constant 1.000000e+00 : f32
    %16 = vector.broadcast %cst_11 : f32 to vector<8x64xf32>
    %17 = arith.addf %16, %15 : vector<8x64xf32>
    %18 = arith.divf %16, %17 : vector<8x64xf32>
    %19 = vector.extract_strided_slice %18 {offsets = [0, 0], sizes = [8, 32], strides = [1, 1]} : vector<8x64xf32> to vector<8x32xf32>
    %20 = vector.extract_strided_slice %18 {offsets = [0, 32], sizes = [8, 32], strides = [1, 1]} : vector<8x64xf32> to vector<8x32xf32>
    %21 = vector.extract_strided_slice %9 {offsets = [0, 64], sizes = [8, 32], strides = [1, 1]} : vector<8x96xf32> to vector<8x32xf32>
    %22 = vector.extract_strided_slice %10 {offsets = [0, 64], sizes = [8, 32], strides = [1, 1]} : vector<8x96xf32> to vector<8x32xf32>
    %23 = vector.broadcast %7 : vector<1x32xf32> to vector<8x32xf32>
    %24 = arith.addf %22, %23 : vector<8x32xf32>
    %25 = arith.mulf %19, %24 : vector<8x32xf32>
    %26 = arith.addf %21, %25 : vector<8x32xf32>
    %27 = math.tanh %26 : vector<8x32xf32>
    %cst_12 = arith.constant 1.000000e+00 : f32
    %28 = vector.broadcast %cst_12 : f32 to vector<8x32xf32>
    %29 = arith.subf %28, %20 : vector<8x32xf32>
    %30 = arith.mulf %29, %27 : vector<8x32xf32>
    %31 = arith.mulf %20, %8 : vector<8x32xf32>
    %32 = arith.addf %30, %31 : vector<8x32xf32>
    %33 = vector.extract_strided_slice %5 {offsets = [8, 0], sizes = [8, 96], strides = [1, 1]} : vector<64x96xf32> to vector<8x96xf32>
    %cst_13 = arith.constant dense<0.000000e+00> : vector<8x96xf32>
    %34 = tpu.matmul %32, %6, %cst_13 {dimension_numbers = #tpu.dot_dimension_numbers<[1], [0], [0], [1], [0, 0, 1, 1], [], []>} : vector<8x32xf32>, vector<32x96xf32>, vector<8x96xf32> -> vector<8x96xf32>
    %35 = vector.extract_strided_slice %33 {offsets = [0, 0], sizes = [8, 64], strides = [1, 1]} : vector<8x96xf32> to vector<8x64xf32>
    %36 = vector.extract_strided_slice %34 {offsets = [0, 0], sizes = [8, 64], strides = [1, 1]} : vector<8x96xf32> to vector<8x64xf32>
    %37 = arith.addf %35, %36 : vector<8x64xf32>
    %38 = arith.negf %37 : vector<8x64xf32>
    %39 = math.exp %38 : vector<8x64xf32>
    %cst_14 = arith.constant 1.000000e+00 : f32
    %40 = vector.broadcast %cst_14 : f32 to vector<8x64xf32>
    %41 = arith.addf %40, %39 : vector<8x64xf32>
    %42 = arith.divf %40, %41 : vector<8x64xf32>
    %43 = vector.extract_strided_slice %42 {offsets = [0, 0], sizes = [8, 32], strides = [1, 1]} : vector<8x64xf32> to vector<8x32xf32>
    %44 = vector.extract_strided_slice %42 {offsets = [0, 32], sizes = [8, 32], strides = [1, 1]} : vector<8x64xf32> to vector<8x32xf32>
    %45 = vector.extract_strided_slice %33 {offsets = [0, 64], sizes = [8, 32], strides = [1, 1]} : vector<8x96xf32> to vector<8x32xf32>
    %46 = vector.extract_strided_slice %34 {offsets = [0, 64], sizes = [8, 32], strides = [1, 1]} : vector<8x96xf32> to vector<8x32xf32>
    %47 = vector.broadcast %7 : vector<1x32xf32> to vector<8x32xf32>
    %48 = arith.addf %46, %47 : vector<8x32xf32>
    %49 = arith.mulf %43, %48 : vector<8x32xf32>
    %50 = arith.addf %45, %49 : vector<8x32xf32>
    %51 = math.tanh %50 : vector<8x32xf32>
    %cst_15 = arith.constant 1.000000e+00 : f32
    %52 = vector.broadcast %cst_15 : f32 to vector<8x32xf32>
    %53 = arith.subf %52, %44 : vector<8x32xf32>
    %54 = arith.mulf %53, %51 : vector<8x32xf32>
    %55 = arith.mulf %44, %32 : vector<8x32xf32>
    %56 = arith.addf %54, %55 : vector<8x32xf32>
    %57 = vector.extract_strided_slice %5 {offsets = [16, 0], sizes = [8, 96], strides = [1, 1]} : vector<64x96xf32> to vector<8x96xf32>
    %cst_16 = arith.constant dense<0.000000e+00> : vector<8x96xf32>
    %58 = tpu.matmul %56, %6, %cst_16 {dimension_numbers = #tpu.dot_dimension_numbers<[1], [0], [0], [1], [0, 0, 1, 1], [], []>} : vector<8x32xf32>, vector<32x96xf32>, vector<8x96xf32> -> vector<8x96xf32>
    %59 = vector.extract_strided_slice %57 {offsets = [0, 0], sizes = [8, 64], strides = [1, 1]} : vector<8x96xf32> to vector<8x64xf32>
    %60 = vector.extract_strided_slice %58 {offsets = [0, 0], sizes = [8, 64], strides = [1, 1]} : vector<8x96xf32> to vector<8x64xf32>
    %61 = arith.addf %59, %60 : vector<8x64xf32>
    %62 = arith.negf %61 : vector<8x64xf32>
    %63 = math.exp %62 : vector<8x64xf32>
    %cst_17 = arith.constant 1.000000e+00 : f32
    %64 = vector.broadcast %cst_17 : f32 to vector<8x64xf32>
    %65 = arith.addf %64, %63 : vector<8x64xf32>
    %66 = arith.divf %64, %65 : vector<8x64xf32>
    %67 = vector.extract_strided_slice %66 {offsets = [0, 0], sizes = [8, 32], strides = [1, 1]} : vector<8x64xf32> to vector<8x32xf32>
    %68 = vector.extract_strided_slice %66 {offsets = [0, 32], sizes = [8, 32], strides = [1, 1]} : vector<8x64xf32> to vector<8x32xf32>
    %69 = vector.extract_strided_slice %57 {offsets = [0, 64], sizes = [8, 32], strides = [1, 1]} : vector<8x96xf32> to vector<8x32xf32>
    %70 = vector.extract_strided_slice %58 {offsets = [0, 64], sizes = [8, 32], strides = [1, 1]} : vector<8x96xf32> to vector<8x32xf32>
    %71 = vector.broadcast %7 : vector<1x32xf32> to vector<8x32xf32>
    %72 = arith.addf %70, %71 : vector<8x32xf32>
    %73 = arith.mulf %67, %72 : vector<8x32xf32>
    %74 = arith.addf %69, %73 : vector<8x32xf32>
    %75 = math.tanh %74 : vector<8x32xf32>
    %cst_18 = arith.constant 1.000000e+00 : f32
    %76 = vector.broadcast %cst_18 : f32 to vector<8x32xf32>
    %77 = arith.subf %76, %68 : vector<8x32xf32>
    %78 = arith.mulf %77, %75 : vector<8x32xf32>
    %79 = arith.mulf %68, %56 : vector<8x32xf32>
    %80 = arith.addf %78, %79 : vector<8x32xf32>
    %81 = vector.extract_strided_slice %5 {offsets = [24, 0], sizes = [8, 96], strides = [1, 1]} : vector<64x96xf32> to vector<8x96xf32>
    %cst_19 = arith.constant dense<0.000000e+00> : vector<8x96xf32>
    %82 = tpu.matmul %80, %6, %cst_19 {dimension_numbers = #tpu.dot_dimension_numbers<[1], [0], [0], [1], [0, 0, 1, 1], [], []>} : vector<8x32xf32>, vector<32x96xf32>, vector<8x96xf32> -> vector<8x96xf32>
    %83 = vector.extract_strided_slice %81 {offsets = [0, 0], sizes = [8, 64], strides = [1, 1]} : vector<8x96xf32> to vector<8x64xf32>
    %84 = vector.extract_strided_slice %82 {offsets = [0, 0], sizes = [8, 64], strides = [1, 1]} : vector<8x96xf32> to vector<8x64xf32>
    %85 = arith.addf %83, %84 : vector<8x64xf32>
    %86 = arith.negf %85 : vector<8x64xf32>
    %87 = math.exp %86 : vector<8x64xf32>
    %cst_20 = arith.constant 1.000000e+00 : f32
    %88 = vector.broadcast %cst_20 : f32 to vector<8x64xf32>
    %89 = arith.addf %88, %87 : vector<8x64xf32>
    %90 = arith.divf %88, %89 : vector<8x64xf32>
    %91 = vector.extract_strided_slice %90 {offsets = [0, 0], sizes = [8, 32], strides = [1, 1]} : vector<8x64xf32> to vector<8x32xf32>
    %92 = vector.extract_strided_slice %90 {offsets = [0, 32], sizes = [8, 32], strides = [1, 1]} : vector<8x64xf32> to vector<8x32xf32>
    %93 = vector.extract_strided_slice %81 {offsets = [0, 64], sizes = [8, 32], strides = [1, 1]} : vector<8x96xf32> to vector<8x32xf32>
    %94 = vector.extract_strided_slice %82 {offsets = [0, 64], sizes = [8, 32], strides = [1, 1]} : vector<8x96xf32> to vector<8x32xf32>
    %95 = vector.broadcast %7 : vector<1x32xf32> to vector<8x32xf32>
    %96 = arith.addf %94, %95 : vector<8x32xf32>
    %97 = arith.mulf %91, %96 : vector<8x32xf32>
    %98 = arith.addf %93, %97 : vector<8x32xf32>
    %99 = math.tanh %98 : vector<8x32xf32>
    %cst_21 = arith.constant 1.000000e+00 : f32
    %100 = vector.broadcast %cst_21 : f32 to vector<8x32xf32>
    %101 = arith.subf %100, %92 : vector<8x32xf32>
    %102 = arith.mulf %101, %99 : vector<8x32xf32>
    %103 = arith.mulf %92, %80 : vector<8x32xf32>
    %104 = arith.addf %102, %103 : vector<8x32xf32>
    %105 = vector.extract_strided_slice %5 {offsets = [32, 0], sizes = [8, 96], strides = [1, 1]} : vector<64x96xf32> to vector<8x96xf32>
    %cst_22 = arith.constant dense<0.000000e+00> : vector<8x96xf32>
    %106 = tpu.matmul %104, %6, %cst_22 {dimension_numbers = #tpu.dot_dimension_numbers<[1], [0], [0], [1], [0, 0, 1, 1], [], []>} : vector<8x32xf32>, vector<32x96xf32>, vector<8x96xf32> -> vector<8x96xf32>
    %107 = vector.extract_strided_slice %105 {offsets = [0, 0], sizes = [8, 64], strides = [1, 1]} : vector<8x96xf32> to vector<8x64xf32>
    %108 = vector.extract_strided_slice %106 {offsets = [0, 0], sizes = [8, 64], strides = [1, 1]} : vector<8x96xf32> to vector<8x64xf32>
    %109 = arith.addf %107, %108 : vector<8x64xf32>
    %110 = arith.negf %109 : vector<8x64xf32>
    %111 = math.exp %110 : vector<8x64xf32>
    %cst_23 = arith.constant 1.000000e+00 : f32
    %112 = vector.broadcast %cst_23 : f32 to vector<8x64xf32>
    %113 = arith.addf %112, %111 : vector<8x64xf32>
    %114 = arith.divf %112, %113 : vector<8x64xf32>
    %115 = vector.extract_strided_slice %114 {offsets = [0, 0], sizes = [8, 32], strides = [1, 1]} : vector<8x64xf32> to vector<8x32xf32>
    %116 = vector.extract_strided_slice %114 {offsets = [0, 32], sizes = [8, 32], strides = [1, 1]} : vector<8x64xf32> to vector<8x32xf32>
    %117 = vector.extract_strided_slice %105 {offsets = [0, 64], sizes = [8, 32], strides = [1, 1]} : vector<8x96xf32> to vector<8x32xf32>
    %118 = vector.extract_strided_slice %106 {offsets = [0, 64], sizes = [8, 32], strides = [1, 1]} : vector<8x96xf32> to vector<8x32xf32>
    %119 = vector.broadcast %7 : vector<1x32xf32> to vector<8x32xf32>
    %120 = arith.addf %118, %119 : vector<8x32xf32>
    %121 = arith.mulf %115, %120 : vector<8x32xf32>
    %122 = arith.addf %117, %121 : vector<8x32xf32>
    %123 = math.tanh %122 : vector<8x32xf32>
    %cst_24 = arith.constant 1.000000e+00 : f32
    %124 = vector.broadcast %cst_24 : f32 to vector<8x32xf32>
    %125 = arith.subf %124, %116 : vector<8x32xf32>
    %126 = arith.mulf %125, %123 : vector<8x32xf32>
    %127 = arith.mulf %116, %104 : vector<8x32xf32>
    %128 = arith.addf %126, %127 : vector<8x32xf32>
    %129 = vector.extract_strided_slice %5 {offsets = [40, 0], sizes = [8, 96], strides = [1, 1]} : vector<64x96xf32> to vector<8x96xf32>
    %cst_25 = arith.constant dense<0.000000e+00> : vector<8x96xf32>
    %130 = tpu.matmul %128, %6, %cst_25 {dimension_numbers = #tpu.dot_dimension_numbers<[1], [0], [0], [1], [0, 0, 1, 1], [], []>} : vector<8x32xf32>, vector<32x96xf32>, vector<8x96xf32> -> vector<8x96xf32>
    %131 = vector.extract_strided_slice %129 {offsets = [0, 0], sizes = [8, 64], strides = [1, 1]} : vector<8x96xf32> to vector<8x64xf32>
    %132 = vector.extract_strided_slice %130 {offsets = [0, 0], sizes = [8, 64], strides = [1, 1]} : vector<8x96xf32> to vector<8x64xf32>
    %133 = arith.addf %131, %132 : vector<8x64xf32>
    %134 = arith.negf %133 : vector<8x64xf32>
    %135 = math.exp %134 : vector<8x64xf32>
    %cst_26 = arith.constant 1.000000e+00 : f32
    %136 = vector.broadcast %cst_26 : f32 to vector<8x64xf32>
    %137 = arith.addf %136, %135 : vector<8x64xf32>
    %138 = arith.divf %136, %137 : vector<8x64xf32>
    %139 = vector.extract_strided_slice %138 {offsets = [0, 0], sizes = [8, 32], strides = [1, 1]} : vector<8x64xf32> to vector<8x32xf32>
    %140 = vector.extract_strided_slice %138 {offsets = [0, 32], sizes = [8, 32], strides = [1, 1]} : vector<8x64xf32> to vector<8x32xf32>
    %141 = vector.extract_strided_slice %129 {offsets = [0, 64], sizes = [8, 32], strides = [1, 1]} : vector<8x96xf32> to vector<8x32xf32>
    %142 = vector.extract_strided_slice %130 {offsets = [0, 64], sizes = [8, 32], strides = [1, 1]} : vector<8x96xf32> to vector<8x32xf32>
    %143 = vector.broadcast %7 : vector<1x32xf32> to vector<8x32xf32>
    %144 = arith.addf %142, %143 : vector<8x32xf32>
    %145 = arith.mulf %139, %144 : vector<8x32xf32>
    %146 = arith.addf %141, %145 : vector<8x32xf32>
    %147 = math.tanh %146 : vector<8x32xf32>
    %cst_27 = arith.constant 1.000000e+00 : f32
    %148 = vector.broadcast %cst_27 : f32 to vector<8x32xf32>
    %149 = arith.subf %148, %140 : vector<8x32xf32>
    %150 = arith.mulf %149, %147 : vector<8x32xf32>
    %151 = arith.mulf %140, %128 : vector<8x32xf32>
    %152 = arith.addf %150, %151 : vector<8x32xf32>
    %153 = vector.extract_strided_slice %5 {offsets = [48, 0], sizes = [8, 96], strides = [1, 1]} : vector<64x96xf32> to vector<8x96xf32>
    %cst_28 = arith.constant dense<0.000000e+00> : vector<8x96xf32>
    %154 = tpu.matmul %152, %6, %cst_28 {dimension_numbers = #tpu.dot_dimension_numbers<[1], [0], [0], [1], [0, 0, 1, 1], [], []>} : vector<8x32xf32>, vector<32x96xf32>, vector<8x96xf32> -> vector<8x96xf32>
    %155 = vector.extract_strided_slice %153 {offsets = [0, 0], sizes = [8, 64], strides = [1, 1]} : vector<8x96xf32> to vector<8x64xf32>
    %156 = vector.extract_strided_slice %154 {offsets = [0, 0], sizes = [8, 64], strides = [1, 1]} : vector<8x96xf32> to vector<8x64xf32>
    %157 = arith.addf %155, %156 : vector<8x64xf32>
    %158 = arith.negf %157 : vector<8x64xf32>
    %159 = math.exp %158 : vector<8x64xf32>
    %cst_29 = arith.constant 1.000000e+00 : f32
    %160 = vector.broadcast %cst_29 : f32 to vector<8x64xf32>
    %161 = arith.addf %160, %159 : vector<8x64xf32>
    %162 = arith.divf %160, %161 : vector<8x64xf32>
    %163 = vector.extract_strided_slice %162 {offsets = [0, 0], sizes = [8, 32], strides = [1, 1]} : vector<8x64xf32> to vector<8x32xf32>
    %164 = vector.extract_strided_slice %162 {offsets = [0, 32], sizes = [8, 32], strides = [1, 1]} : vector<8x64xf32> to vector<8x32xf32>
    %165 = vector.extract_strided_slice %153 {offsets = [0, 64], sizes = [8, 32], strides = [1, 1]} : vector<8x96xf32> to vector<8x32xf32>
    %166 = vector.extract_strided_slice %154 {offsets = [0, 64], sizes = [8, 32], strides = [1, 1]} : vector<8x96xf32> to vector<8x32xf32>
    %167 = vector.broadcast %7 : vector<1x32xf32> to vector<8x32xf32>
    %168 = arith.addf %166, %167 : vector<8x32xf32>
    %169 = arith.mulf %163, %168 : vector<8x32xf32>
    %170 = arith.addf %165, %169 : vector<8x32xf32>
    %171 = math.tanh %170 : vector<8x32xf32>
    %cst_30 = arith.constant 1.000000e+00 : f32
    %172 = vector.broadcast %cst_30 : f32 to vector<8x32xf32>
    %173 = arith.subf %172, %164 : vector<8x32xf32>
    %174 = arith.mulf %173, %171 : vector<8x32xf32>
    %175 = arith.mulf %164, %152 : vector<8x32xf32>
    %176 = arith.addf %174, %175 : vector<8x32xf32>
    %177 = vector.extract_strided_slice %5 {offsets = [56, 0], sizes = [8, 96], strides = [1, 1]} : vector<64x96xf32> to vector<8x96xf32>
    %cst_31 = arith.constant dense<0.000000e+00> : vector<8x96xf32>
    %178 = tpu.matmul %176, %6, %cst_31 {dimension_numbers = #tpu.dot_dimension_numbers<[1], [0], [0], [1], [0, 0, 1, 1], [], []>} : vector<8x32xf32>, vector<32x96xf32>, vector<8x96xf32> -> vector<8x96xf32>
    %179 = vector.extract_strided_slice %177 {offsets = [0, 0], sizes = [8, 64], strides = [1, 1]} : vector<8x96xf32> to vector<8x64xf32>
    %180 = vector.extract_strided_slice %178 {offsets = [0, 0], sizes = [8, 64], strides = [1, 1]} : vector<8x96xf32> to vector<8x64xf32>
    %181 = arith.addf %179, %180 : vector<8x64xf32>
    %182 = arith.negf %181 : vector<8x64xf32>
    %183 = math.exp %182 : vector<8x64xf32>
    %cst_32 = arith.constant 1.000000e+00 : f32
    %184 = vector.broadcast %cst_32 : f32 to vector<8x64xf32>
    %185 = arith.addf %184, %183 : vector<8x64xf32>
    %186 = arith.divf %184, %185 : vector<8x64xf32>
    %187 = vector.extract_strided_slice %186 {offsets = [0, 0], sizes = [8, 32], strides = [1, 1]} : vector<8x64xf32> to vector<8x32xf32>
    %188 = vector.extract_strided_slice %186 {offsets = [0, 32], sizes = [8, 32], strides = [1, 1]} : vector<8x64xf32> to vector<8x32xf32>
    %189 = vector.extract_strided_slice %177 {offsets = [0, 64], sizes = [8, 32], strides = [1, 1]} : vector<8x96xf32> to vector<8x32xf32>
    %190 = vector.extract_strided_slice %178 {offsets = [0, 64], sizes = [8, 32], strides = [1, 1]} : vector<8x96xf32> to vector<8x32xf32>
    %191 = vector.broadcast %7 : vector<1x32xf32> to vector<8x32xf32>
    %192 = arith.addf %190, %191 : vector<8x32xf32>
    %193 = arith.mulf %187, %192 : vector<8x32xf32>
    %194 = arith.addf %189, %193 : vector<8x32xf32>
    %195 = math.tanh %194 : vector<8x32xf32>
    %cst_33 = arith.constant 1.000000e+00 : f32
    %196 = vector.broadcast %cst_33 : f32 to vector<8x32xf32>
    %197 = arith.subf %196, %188 : vector<8x32xf32>
    %198 = arith.mulf %197, %195 : vector<8x32xf32>
    %199 = arith.mulf %188, %176 : vector<8x32xf32>
    %200 = arith.addf %198, %199 : vector<8x32xf32>
    %c0_34 = arith.constant 0 : index
    %c0_35 = arith.constant 0 : index
    %201 = vector.load %arg5[%c0_34, %c0_35] : memref<32x96xf32, #tpu.memory_space<vmem>>, vector<32x96xf32>
    %cst_36 = arith.constant dense<0.000000e+00> : vector<8x96xf32>
    %202 = tpu.matmul %200, %201, %cst_36 {dimension_numbers = #tpu.dot_dimension_numbers<[1], [0], [0], [1], [0, 0, 1, 1], [], []>} : vector<8x32xf32>, vector<32x96xf32>, vector<8x96xf32> -> vector<8x96xf32>
    %c0_37 = arith.constant 0 : index
    %c0_38 = arith.constant 0 : index
    %203 = vector.load %arg7[%c0_37, %c0_38] : memref<1x96xf32, #tpu.memory_space<vmem>>, vector<1x96xf32>
    %204 = vector.broadcast %203 : vector<1x96xf32> to vector<8x96xf32>
    %205 = arith.addf %202, %204 : vector<8x96xf32>
    %c0_39 = arith.constant 0 : index
    %c0_40 = arith.constant 0 : index
    %206 = vector.load %arg6[%c0_39, %c0_40] : memref<32x96xf32, #tpu.memory_space<vmem>>, vector<32x96xf32>
    %c0_41 = arith.constant 0 : index
    %c0_42 = arith.constant 0 : index
    %207 = vector.load %arg8[%c0_41, %c0_42] : memref<1x32xf32, #tpu.memory_space<vmem>>, vector<1x32xf32>
    %cst_43 = arith.constant dense<0.000000e+00> : vector<8x96xf32>
    %208 = tpu.matmul %200, %206, %cst_43 {dimension_numbers = #tpu.dot_dimension_numbers<[1], [0], [0], [1], [0, 0, 1, 1], [], []>} : vector<8x32xf32>, vector<32x96xf32>, vector<8x96xf32> -> vector<8x96xf32>
    %209 = vector.extract_strided_slice %205 {offsets = [0, 0], sizes = [8, 64], strides = [1, 1]} : vector<8x96xf32> to vector<8x64xf32>
    %210 = vector.extract_strided_slice %208 {offsets = [0, 0], sizes = [8, 64], strides = [1, 1]} : vector<8x96xf32> to vector<8x64xf32>
    %211 = arith.addf %209, %210 : vector<8x64xf32>
    %212 = arith.negf %211 : vector<8x64xf32>
    %213 = math.exp %212 : vector<8x64xf32>
    %cst_44 = arith.constant 1.000000e+00 : f32
    %214 = vector.broadcast %cst_44 : f32 to vector<8x64xf32>
    %215 = arith.addf %214, %213 : vector<8x64xf32>
    %216 = arith.divf %214, %215 : vector<8x64xf32>
    %217 = vector.extract_strided_slice %216 {offsets = [0, 0], sizes = [8, 32], strides = [1, 1]} : vector<8x64xf32> to vector<8x32xf32>
    %218 = vector.extract_strided_slice %216 {offsets = [0, 32], sizes = [8, 32], strides = [1, 1]} : vector<8x64xf32> to vector<8x32xf32>
    %219 = vector.extract_strided_slice %205 {offsets = [0, 64], sizes = [8, 32], strides = [1, 1]} : vector<8x96xf32> to vector<8x32xf32>
    %220 = vector.extract_strided_slice %208 {offsets = [0, 64], sizes = [8, 32], strides = [1, 1]} : vector<8x96xf32> to vector<8x32xf32>
    %221 = vector.broadcast %207 : vector<1x32xf32> to vector<8x32xf32>
    %222 = arith.addf %220, %221 : vector<8x32xf32>
    %223 = arith.mulf %217, %222 : vector<8x32xf32>
    %224 = arith.addf %219, %223 : vector<8x32xf32>
    %225 = math.tanh %224 : vector<8x32xf32>
    %cst_45 = arith.constant 1.000000e+00 : f32
    %226 = vector.broadcast %cst_45 : f32 to vector<8x32xf32>
    %227 = arith.subf %226, %218 : vector<8x32xf32>
    %228 = arith.mulf %227, %225 : vector<8x32xf32>
    %229 = arith.mulf %218, %200 : vector<8x32xf32>
    %230 = arith.addf %228, %229 : vector<8x32xf32>
    %cst_46 = arith.constant dense<0.000000e+00> : vector<8x96xf32>
    %231 = tpu.matmul %230, %206, %cst_46 {dimension_numbers = #tpu.dot_dimension_numbers<[1], [0], [0], [1], [0, 0, 1, 1], [], []>} : vector<8x32xf32>, vector<32x96xf32>, vector<8x96xf32> -> vector<8x96xf32>
    %232 = vector.extract_strided_slice %205 {offsets = [0, 0], sizes = [8, 64], strides = [1, 1]} : vector<8x96xf32> to vector<8x64xf32>
    %233 = vector.extract_strided_slice %231 {offsets = [0, 0], sizes = [8, 64], strides = [1, 1]} : vector<8x96xf32> to vector<8x64xf32>
    %234 = arith.addf %232, %233 : vector<8x64xf32>
    %235 = arith.negf %234 : vector<8x64xf32>
    %236 = math.exp %235 : vector<8x64xf32>
    %cst_47 = arith.constant 1.000000e+00 : f32
    %237 = vector.broadcast %cst_47 : f32 to vector<8x64xf32>
    %238 = arith.addf %237, %236 : vector<8x64xf32>
    %239 = arith.divf %237, %238 : vector<8x64xf32>
    %240 = vector.extract_strided_slice %239 {offsets = [0, 0], sizes = [8, 32], strides = [1, 1]} : vector<8x64xf32> to vector<8x32xf32>
    %241 = vector.extract_strided_slice %239 {offsets = [0, 32], sizes = [8, 32], strides = [1, 1]} : vector<8x64xf32> to vector<8x32xf32>
    %242 = vector.extract_strided_slice %205 {offsets = [0, 64], sizes = [8, 32], strides = [1, 1]} : vector<8x96xf32> to vector<8x32xf32>
    %243 = vector.extract_strided_slice %231 {offsets = [0, 64], sizes = [8, 32], strides = [1, 1]} : vector<8x96xf32> to vector<8x32xf32>
    %244 = vector.broadcast %207 : vector<1x32xf32> to vector<8x32xf32>
    %245 = arith.addf %243, %244 : vector<8x32xf32>
    %246 = arith.mulf %240, %245 : vector<8x32xf32>
    %247 = arith.addf %242, %246 : vector<8x32xf32>
    %248 = math.tanh %247 : vector<8x32xf32>
    %cst_48 = arith.constant 1.000000e+00 : f32
    %249 = vector.broadcast %cst_48 : f32 to vector<8x32xf32>
    %250 = arith.subf %249, %241 : vector<8x32xf32>
    %251 = arith.mulf %250, %248 : vector<8x32xf32>
    %252 = arith.mulf %241, %230 : vector<8x32xf32>
    %253 = arith.addf %251, %252 : vector<8x32xf32>
    %cst_49 = arith.constant dense<0.000000e+00> : vector<8x96xf32>
    %254 = tpu.matmul %253, %206, %cst_49 {dimension_numbers = #tpu.dot_dimension_numbers<[1], [0], [0], [1], [0, 0, 1, 1], [], []>} : vector<8x32xf32>, vector<32x96xf32>, vector<8x96xf32> -> vector<8x96xf32>
    %255 = vector.extract_strided_slice %205 {offsets = [0, 0], sizes = [8, 64], strides = [1, 1]} : vector<8x96xf32> to vector<8x64xf32>
    %256 = vector.extract_strided_slice %254 {offsets = [0, 0], sizes = [8, 64], strides = [1, 1]} : vector<8x96xf32> to vector<8x64xf32>
    %257 = arith.addf %255, %256 : vector<8x64xf32>
    %258 = arith.negf %257 : vector<8x64xf32>
    %259 = math.exp %258 : vector<8x64xf32>
    %cst_50 = arith.constant 1.000000e+00 : f32
    %260 = vector.broadcast %cst_50 : f32 to vector<8x64xf32>
    %261 = arith.addf %260, %259 : vector<8x64xf32>
    %262 = arith.divf %260, %261 : vector<8x64xf32>
    %263 = vector.extract_strided_slice %262 {offsets = [0, 0], sizes = [8, 32], strides = [1, 1]} : vector<8x64xf32> to vector<8x32xf32>
    %264 = vector.extract_strided_slice %262 {offsets = [0, 32], sizes = [8, 32], strides = [1, 1]} : vector<8x64xf32> to vector<8x32xf32>
    %265 = vector.extract_strided_slice %205 {offsets = [0, 64], sizes = [8, 32], strides = [1, 1]} : vector<8x96xf32> to vector<8x32xf32>
    %266 = vector.extract_strided_slice %254 {offsets = [0, 64], sizes = [8, 32], strides = [1, 1]} : vector<8x96xf32> to vector<8x32xf32>
    %267 = vector.broadcast %207 : vector<1x32xf32> to vector<8x32xf32>
    %268 = arith.addf %266, %267 : vector<8x32xf32>
    %269 = arith.mulf %263, %268 : vector<8x32xf32>
    %270 = arith.addf %265, %269 : vector<8x32xf32>
    %271 = math.tanh %270 : vector<8x32xf32>
    %cst_51 = arith.constant 1.000000e+00 : f32
    %272 = vector.broadcast %cst_51 : f32 to vector<8x32xf32>
    %273 = arith.subf %272, %264 : vector<8x32xf32>
    %274 = arith.mulf %273, %271 : vector<8x32xf32>
    %275 = arith.mulf %264, %253 : vector<8x32xf32>
    %276 = arith.addf %274, %275 : vector<8x32xf32>
    %cst_52 = arith.constant dense<0.000000e+00> : vector<8x96xf32>
    %277 = tpu.matmul %276, %206, %cst_52 {dimension_numbers = #tpu.dot_dimension_numbers<[1], [0], [0], [1], [0, 0, 1, 1], [], []>} : vector<8x32xf32>, vector<32x96xf32>, vector<8x96xf32> -> vector<8x96xf32>
    %278 = vector.extract_strided_slice %205 {offsets = [0, 0], sizes = [8, 64], strides = [1, 1]} : vector<8x96xf32> to vector<8x64xf32>
    %279 = vector.extract_strided_slice %277 {offsets = [0, 0], sizes = [8, 64], strides = [1, 1]} : vector<8x96xf32> to vector<8x64xf32>
    %280 = arith.addf %278, %279 : vector<8x64xf32>
    %281 = arith.negf %280 : vector<8x64xf32>
    %282 = math.exp %281 : vector<8x64xf32>
    %cst_53 = arith.constant 1.000000e+00 : f32
    %283 = vector.broadcast %cst_53 : f32 to vector<8x64xf32>
    %284 = arith.addf %283, %282 : vector<8x64xf32>
    %285 = arith.divf %283, %284 : vector<8x64xf32>
    %286 = vector.extract_strided_slice %285 {offsets = [0, 0], sizes = [8, 32], strides = [1, 1]} : vector<8x64xf32> to vector<8x32xf32>
    %287 = vector.extract_strided_slice %285 {offsets = [0, 32], sizes = [8, 32], strides = [1, 1]} : vector<8x64xf32> to vector<8x32xf32>
    %288 = vector.extract_strided_slice %205 {offsets = [0, 64], sizes = [8, 32], strides = [1, 1]} : vector<8x96xf32> to vector<8x32xf32>
    %289 = vector.extract_strided_slice %277 {offsets = [0, 64], sizes = [8, 32], strides = [1, 1]} : vector<8x96xf32> to vector<8x32xf32>
    %290 = vector.broadcast %207 : vector<1x32xf32> to vector<8x32xf32>
    %291 = arith.addf %289, %290 : vector<8x32xf32>
    %292 = arith.mulf %286, %291 : vector<8x32xf32>
    %293 = arith.addf %288, %292 : vector<8x32xf32>
    %294 = math.tanh %293 : vector<8x32xf32>
    %cst_54 = arith.constant 1.000000e+00 : f32
    %295 = vector.broadcast %cst_54 : f32 to vector<8x32xf32>
    %296 = arith.subf %295, %287 : vector<8x32xf32>
    %297 = arith.mulf %296, %294 : vector<8x32xf32>
    %298 = arith.mulf %287, %276 : vector<8x32xf32>
    %299 = arith.addf %297, %298 : vector<8x32xf32>
    %cst_55 = arith.constant dense<0.000000e+00> : vector<8x96xf32>
    %300 = tpu.matmul %299, %206, %cst_55 {dimension_numbers = #tpu.dot_dimension_numbers<[1], [0], [0], [1], [0, 0, 1, 1], [], []>} : vector<8x32xf32>, vector<32x96xf32>, vector<8x96xf32> -> vector<8x96xf32>
    %301 = vector.extract_strided_slice %205 {offsets = [0, 0], sizes = [8, 64], strides = [1, 1]} : vector<8x96xf32> to vector<8x64xf32>
    %302 = vector.extract_strided_slice %300 {offsets = [0, 0], sizes = [8, 64], strides = [1, 1]} : vector<8x96xf32> to vector<8x64xf32>
    %303 = arith.addf %301, %302 : vector<8x64xf32>
    %304 = arith.negf %303 : vector<8x64xf32>
    %305 = math.exp %304 : vector<8x64xf32>
    %cst_56 = arith.constant 1.000000e+00 : f32
    %306 = vector.broadcast %cst_56 : f32 to vector<8x64xf32>
    %307 = arith.addf %306, %305 : vector<8x64xf32>
    %308 = arith.divf %306, %307 : vector<8x64xf32>
    %309 = vector.extract_strided_slice %308 {offsets = [0, 0], sizes = [8, 32], strides = [1, 1]} : vector<8x64xf32> to vector<8x32xf32>
    %310 = vector.extract_strided_slice %308 {offsets = [0, 32], sizes = [8, 32], strides = [1, 1]} : vector<8x64xf32> to vector<8x32xf32>
    %311 = vector.extract_strided_slice %205 {offsets = [0, 64], sizes = [8, 32], strides = [1, 1]} : vector<8x96xf32> to vector<8x32xf32>
    %312 = vector.extract_strided_slice %300 {offsets = [0, 64], sizes = [8, 32], strides = [1, 1]} : vector<8x96xf32> to vector<8x32xf32>
    %313 = vector.broadcast %207 : vector<1x32xf32> to vector<8x32xf32>
    %314 = arith.addf %312, %313 : vector<8x32xf32>
    %315 = arith.mulf %309, %314 : vector<8x32xf32>
    %316 = arith.addf %311, %315 : vector<8x32xf32>
    %317 = math.tanh %316 : vector<8x32xf32>
    %cst_57 = arith.constant 1.000000e+00 : f32
    %318 = vector.broadcast %cst_57 : f32 to vector<8x32xf32>
    %319 = arith.subf %318, %310 : vector<8x32xf32>
    %320 = arith.mulf %319, %317 : vector<8x32xf32>
    %321 = arith.mulf %310, %299 : vector<8x32xf32>
    %322 = arith.addf %320, %321 : vector<8x32xf32>
    %cst_58 = arith.constant dense<0.000000e+00> : vector<8x96xf32>
    %323 = tpu.matmul %322, %206, %cst_58 {dimension_numbers = #tpu.dot_dimension_numbers<[1], [0], [0], [1], [0, 0, 1, 1], [], []>} : vector<8x32xf32>, vector<32x96xf32>, vector<8x96xf32> -> vector<8x96xf32>
    %324 = vector.extract_strided_slice %205 {offsets = [0, 0], sizes = [8, 64], strides = [1, 1]} : vector<8x96xf32> to vector<8x64xf32>
    %325 = vector.extract_strided_slice %323 {offsets = [0, 0], sizes = [8, 64], strides = [1, 1]} : vector<8x96xf32> to vector<8x64xf32>
    %326 = arith.addf %324, %325 : vector<8x64xf32>
    %327 = arith.negf %326 : vector<8x64xf32>
    %328 = math.exp %327 : vector<8x64xf32>
    %cst_59 = arith.constant 1.000000e+00 : f32
    %329 = vector.broadcast %cst_59 : f32 to vector<8x64xf32>
    %330 = arith.addf %329, %328 : vector<8x64xf32>
    %331 = arith.divf %329, %330 : vector<8x64xf32>
    %332 = vector.extract_strided_slice %331 {offsets = [0, 0], sizes = [8, 32], strides = [1, 1]} : vector<8x64xf32> to vector<8x32xf32>
    %333 = vector.extract_strided_slice %331 {offsets = [0, 32], sizes = [8, 32], strides = [1, 1]} : vector<8x64xf32> to vector<8x32xf32>
    %334 = vector.extract_strided_slice %205 {offsets = [0, 64], sizes = [8, 32], strides = [1, 1]} : vector<8x96xf32> to vector<8x32xf32>
    %335 = vector.extract_strided_slice %323 {offsets = [0, 64], sizes = [8, 32], strides = [1, 1]} : vector<8x96xf32> to vector<8x32xf32>
    %336 = vector.broadcast %207 : vector<1x32xf32> to vector<8x32xf32>
    %337 = arith.addf %335, %336 : vector<8x32xf32>
    %338 = arith.mulf %332, %337 : vector<8x32xf32>
    %339 = arith.addf %334, %338 : vector<8x32xf32>
    %340 = math.tanh %339 : vector<8x32xf32>
    %cst_60 = arith.constant 1.000000e+00 : f32
    %341 = vector.broadcast %cst_60 : f32 to vector<8x32xf32>
    %342 = arith.subf %341, %333 : vector<8x32xf32>
    %343 = arith.mulf %342, %340 : vector<8x32xf32>
    %344 = arith.mulf %333, %322 : vector<8x32xf32>
    %345 = arith.addf %343, %344 : vector<8x32xf32>
    %cst_61 = arith.constant dense<0.000000e+00> : vector<8x96xf32>
    %346 = tpu.matmul %345, %206, %cst_61 {dimension_numbers = #tpu.dot_dimension_numbers<[1], [0], [0], [1], [0, 0, 1, 1], [], []>} : vector<8x32xf32>, vector<32x96xf32>, vector<8x96xf32> -> vector<8x96xf32>
    %347 = vector.extract_strided_slice %205 {offsets = [0, 0], sizes = [8, 64], strides = [1, 1]} : vector<8x96xf32> to vector<8x64xf32>
    %348 = vector.extract_strided_slice %346 {offsets = [0, 0], sizes = [8, 64], strides = [1, 1]} : vector<8x96xf32> to vector<8x64xf32>
    %349 = arith.addf %347, %348 : vector<8x64xf32>
    %350 = arith.negf %349 : vector<8x64xf32>
    %351 = math.exp %350 : vector<8x64xf32>
    %cst_62 = arith.constant 1.000000e+00 : f32
    %352 = vector.broadcast %cst_62 : f32 to vector<8x64xf32>
    %353 = arith.addf %352, %351 : vector<8x64xf32>
    %354 = arith.divf %352, %353 : vector<8x64xf32>
    %355 = vector.extract_strided_slice %354 {offsets = [0, 0], sizes = [8, 32], strides = [1, 1]} : vector<8x64xf32> to vector<8x32xf32>
    %356 = vector.extract_strided_slice %354 {offsets = [0, 32], sizes = [8, 32], strides = [1, 1]} : vector<8x64xf32> to vector<8x32xf32>
    %357 = vector.extract_strided_slice %205 {offsets = [0, 64], sizes = [8, 32], strides = [1, 1]} : vector<8x96xf32> to vector<8x32xf32>
    %358 = vector.extract_strided_slice %346 {offsets = [0, 64], sizes = [8, 32], strides = [1, 1]} : vector<8x96xf32> to vector<8x32xf32>
    %359 = vector.broadcast %207 : vector<1x32xf32> to vector<8x32xf32>
    %360 = arith.addf %358, %359 : vector<8x32xf32>
    %361 = arith.mulf %355, %360 : vector<8x32xf32>
    %362 = arith.addf %357, %361 : vector<8x32xf32>
    %363 = math.tanh %362 : vector<8x32xf32>
    %cst_63 = arith.constant 1.000000e+00 : f32
    %364 = vector.broadcast %cst_63 : f32 to vector<8x32xf32>
    %365 = arith.subf %364, %356 : vector<8x32xf32>
    %366 = arith.mulf %365, %363 : vector<8x32xf32>
    %367 = arith.mulf %356, %345 : vector<8x32xf32>
    %368 = arith.addf %366, %367 : vector<8x32xf32>
    %cst_64 = arith.constant dense<0.000000e+00> : vector<8x96xf32>
    %369 = tpu.matmul %368, %206, %cst_64 {dimension_numbers = #tpu.dot_dimension_numbers<[1], [0], [0], [1], [0, 0, 1, 1], [], []>} : vector<8x32xf32>, vector<32x96xf32>, vector<8x96xf32> -> vector<8x96xf32>
    %370 = vector.extract_strided_slice %205 {offsets = [0, 0], sizes = [8, 64], strides = [1, 1]} : vector<8x96xf32> to vector<8x64xf32>
    %371 = vector.extract_strided_slice %369 {offsets = [0, 0], sizes = [8, 64], strides = [1, 1]} : vector<8x96xf32> to vector<8x64xf32>
    %372 = arith.addf %370, %371 : vector<8x64xf32>
    %373 = arith.negf %372 : vector<8x64xf32>
    %374 = math.exp %373 : vector<8x64xf32>
    %cst_65 = arith.constant 1.000000e+00 : f32
    %375 = vector.broadcast %cst_65 : f32 to vector<8x64xf32>
    %376 = arith.addf %375, %374 : vector<8x64xf32>
    %377 = arith.divf %375, %376 : vector<8x64xf32>
    %378 = vector.extract_strided_slice %377 {offsets = [0, 0], sizes = [8, 32], strides = [1, 1]} : vector<8x64xf32> to vector<8x32xf32>
    %379 = vector.extract_strided_slice %377 {offsets = [0, 32], sizes = [8, 32], strides = [1, 1]} : vector<8x64xf32> to vector<8x32xf32>
    %380 = vector.extract_strided_slice %205 {offsets = [0, 64], sizes = [8, 32], strides = [1, 1]} : vector<8x96xf32> to vector<8x32xf32>
    %381 = vector.extract_strided_slice %369 {offsets = [0, 64], sizes = [8, 32], strides = [1, 1]} : vector<8x96xf32> to vector<8x32xf32>
    %382 = vector.broadcast %207 : vector<1x32xf32> to vector<8x32xf32>
    %383 = arith.addf %381, %382 : vector<8x32xf32>
    %384 = arith.mulf %378, %383 : vector<8x32xf32>
    %385 = arith.addf %380, %384 : vector<8x32xf32>
    %386 = math.tanh %385 : vector<8x32xf32>
    %cst_66 = arith.constant 1.000000e+00 : f32
    %387 = vector.broadcast %cst_66 : f32 to vector<8x32xf32>
    %388 = arith.subf %387, %379 : vector<8x32xf32>
    %389 = arith.mulf %388, %386 : vector<8x32xf32>
    %390 = arith.mulf %379, %368 : vector<8x32xf32>
    %391 = arith.addf %389, %390 : vector<8x32xf32>
    %392 = tpu.concatenate %230, %253, %276, %299, %322, %345, %368, %391 in 0 : vector<8x32xf32>, vector<8x32xf32>, vector<8x32xf32>, vector<8x32xf32>, vector<8x32xf32>, vector<8x32xf32>, vector<8x32xf32>, vector<8x32xf32> -> vector<64x32xf32>
    %c0_67 = arith.constant 0 : index
    %c0_68 = arith.constant 0 : index
    %393 = vector.load %arg9[%c0_67, %c0_68] : memref<32x4xf32, #tpu.memory_space<vmem>>, vector<32x4xf32>
    %cst_69 = arith.constant dense<0.000000e+00> : vector<64x4xf32>
    %394 = tpu.matmul %392, %393, %cst_69 {dimension_numbers = #tpu.dot_dimension_numbers<[1], [0], [0], [1], [0, 0, 1, 1], [], []>} : vector<64x32xf32>, vector<32x4xf32>, vector<64x4xf32> -> vector<64x4xf32>
    %c0_70 = arith.constant 0 : index
    %c0_71 = arith.constant 0 : index
    %395 = vector.load %arg10[%c0_70, %c0_71] : memref<1x4xf32, #tpu.memory_space<vmem>>, vector<1x4xf32>
    %396 = vector.broadcast %395 : vector<1x4xf32> to vector<64x4xf32>
    %397 = arith.addf %394, %396 : vector<64x4xf32>
    %c0_72 = arith.constant 0 : index
    %c0_73 = arith.constant 0 : index
    %398 = vector.load %arg11[%c0_72, %c0_73] : memref<64x4xf32, #tpu.memory_space<vmem>>, vector<64x4xf32>
    tpu.vector_store %arg11[%c0_72, %c0_73], %397 {strides = array<i32>} : memref<64x4xf32, #tpu.memory_space<vmem>>, vector<64x4xf32>,
    return
  }
}

</mosaic_0001>

<bundles_post_ra>
// kernel: seq2seq_pallas.1
= control target key start
LH: loop header
LB: loop body
LE: loop exit
PB: predicated region body
PF: predicated region fallthrough
CT: control target
= control target key end

     0   :  { %vm79_vm0 = vcmask 1043456   ;;  %vm54_vm1 = vcmask 31744   ;;  %v2651_v3 = vmov 0.0|0.0   ;;  %vm2652_vm2 = vmmov 0   ;;  %s3137_s1 = inlined_call_operand.vmem [shape: f32[4,96], index: 1, kind: input, shape index: {}]   ;;  %s3138_s0 = inlined_call_operand.vmem [shape: f32[64,4], index: 0, kind: input, shape index: {}]   ;;  %s3139_s2 = inlined_call_operand.vmem [shape: f32[32,96], index: 2, kind: input, shape index: {}]   ;;  %s3140_s4 = inlined_call_operand.vmem [shape: f32[1,32], index: 4, kind: input, shape index: {}]   ;;  %s3141_s3 = inlined_call_operand.vmem [shape: f32[1,96], index: 3, kind: input, shape index: {}]   ;;  %s3142_s5 = inlined_call_operand.vmem [shape: f32[32,96], index: 5, kind: input, shape index: {}]   ;;  %s3143_s6 = inlined_call_operand.vmem [shape: f32[32,96], index: 6, kind: input, shape index: {}]   ;;  %s3144_s8 = inlined_call_operand.vmem [shape: f32[1,32], index: 8, kind: input, shape index: {}]   ;;  %s3145_s7 = inlined_call_operand.vmem [shape: f32[1,96], index: 7, kind: input, shape index: {}]   ;;  %s3146_s9 = inlined_call_operand.vmem [shape: f32[32,4], index: 9, kind: input, shape index: {}]   ;;  %s3147_s10 = inlined_call_operand.vmem [shape: f32[1,4], index: 10, kind: input, shape index: {}]   ;;  %s3148_s11 = inlined_call_operand.vmem [shape: f32[64,4], index: 11, kind: output, shape index: {}]  }
   0x1   :  { %v46_v0 = vld [vmem:[%s3137_s1] sm:$0xf]  ;;  %v39_v2 = vld [vmem:[%s3138_s0 + $0x8] sm:$0xff]  ;;  %2446 = vmatprep.subr.bf16.mxu1 %v2651_v3  ;;  %v40_v6 = vld [vmem:[%s3138_s0 + $0x10] sm:$0xff]  ;;  %v2653_v8 = vmov 0.0   ;;  %vm193_vm3 = vcmask 261120  }
   0x2   :  { %v38_v1 = vld [vmem:[%s3138_s0] sm:$0xff]  ;;  %2219 = vmatprep.subr.msk.mxu0 %vm79_vm0, %v46_v0  ;;  %v189_v5 = vld [vmem:[%s3139_s2 + $0x8] sm:$0xff]  ;;  %2252 = vmatprep.mubr.msk.f32.mxu1 %vm2652_vm2, %v2653_v8  ;;  %v190_v9 = vld [vmem:[%s3139_s2 + $0x10] sm:$0xff] }
   0x3   :  { %2221 = vmatprep.mubr.msk.f32.mxu0 %vm54_vm1, %v38_v1  ;;  %v188_v4 = vld [vmem:[%s3139_s2] sm:$0xff]  ;;  %2220 = vmatpush3.msk.msra.mxu0 %vm79_vm0, %v46_v0  ;;  %v191_v10 = vld [vmem:[%s3139_s2 + $0x18] sm:$0xff]  ;;  %s2654_s2 = smov 64   ;;  %v43_v15 = vld [vmem:[%s3138_s0 + $0x28] sm:$0xff] }
   0x4   :  { %v2736_v7 = vpack.c.bf16 %v189_v5, %v188_v4  ;;  %2222 = vmatmul.mubr.msk.f32.vlgmr.msra.gmra.mrb[0].mxu0 %vm54_vm1, %v39_v2  ;;  %2440 = vmatprep.subr.bf16.mxu0 %v2651_v3  ;;  %v41_v11 = vld [vmem:[%s3138_s0 + $0x18] sm:$0xff]  ;;  %v2753_v12 = vpack.c.bf16 %v191_v10, %v190_v9  ;;  %v2070_v13 = vld [vmem:[%s3140_s4] ss:$0 sm:$0xff]  ;;  %v44_v16 = vld [vmem:[%s3138_s0 + $0x30] sm:$0xff] }
   0x5   :  { %2224 = vmatprep.mubr.msk.f32.mxu0 %vm54_vm1, %v40_v6  ;;  %v42_v14 = vld [vmem:[%s3138_s0 + $0x20] sm:$0xff]  ;;  %279 = vrot.lane.b32.xlu0 %v2070_v13, %s2654_s2  ;;  %v45_v17 = vld [vmem:[%s3138_s0 + $0x38] sm:$0xff] }
   0x6   :  { %2442 = vmatpush3.bf16.msra.mxu0 %v2736_v7  ;;  %2448 = vmatpush3.bf16.msra.mxu1 %v2736_v7  ;;  %v2059_v18 = vld [vmem:[%s3141_s3] ss:$0 sm:$0xff]  ;;  %s2655_s3 = smov 96  }
   0x7   :  { %2443 = vmatprep.subr.bf16.mxu0 %v2651_v3  ;;  %2449 = vmatprep.subr.bf16.mxu1 %v2651_v3 }
   0x8   :  { %2225 = vmatmul.mubr.msk.f32.gmra.mrb[2].mxu0 %vm54_vm1, %v41_v11 }
   0x9   :  { %2227 = vmatprep.mubr.msk.f32.mxu0 %vm54_vm1, %v42_v14 }
   0xa   :  { %2445 = vmatpush3.bf16.msra.mxu0 %v2753_v12  ;;  %2451 = vmatpush3.bf16.msra.mxu1 %v2753_v12 }
   0xb   :  { %2452 = vmatprep.subr.bf16.mxu0 %v2651_v3  ;;  %2458 = vmatprep.subr.bf16.mxu1 %v2651_v3 }
   0xc   :  { %2228 = vmatmul.mubr.msk.f32.gmra.mrb[4].mxu0 %vm54_vm1, %v43_v15 }
   0xd   :  { %2230 = vmatprep.mubr.msk.f32.mxu0 %vm54_vm1, %v44_v16 }
  0x10   :  { %2231 = vmatmul.mubr.msk.f32.gmra.mrb[6].mxu0 %vm54_vm1, %v45_v17 }
  0x11   :  { %2241 = vmatprep.mubr.msk.f32.mxu0 %vm2652_vm2, %v2653_v8 }
  0x14   :  { %2242 = vmatmul.mubr.f32.vlgmr.msra.gmra.mrb[8].mxu0 %v2653_v8 }
  0x15   :  { %2454 = vmatpush3.bf16.msra.mxu0 %v2736_v7  ;;  %2263 = vmatprep.mubr.msk.f32.mxu0 %vm2652_vm2, %v2653_v8 }
  0x16   :  { %2455 = vmatprep.subr.bf16.mxu0 %v2651_v3 }
  0x19   :  { %2457 = vmatpush3.bf16.msra.mxu0 %v2753_v12 }
  0x1a   :  { %2464 = vmatprep.subr.bf16.mxu0 %v2651_v3 }
  0x77   :  { %v2809_v34 = vpop.permute.xlu0 %279 }
  0xd7   :  { %v2223_v19 = vpop.f32.mrb[0].mxu0 }
  0xd8   :  { %v2795_v20 = vadd.f32 %v2223_v19, %v2059_v18  ;;  %v149_v21 = vpop.f32.mrb[1].mxu0 }
  0xd9   :  { %v150_v38 = vadd.f32 %v2059_v18, %v149_v21 }
  0xdb   :  { %v2226_v22 = vpop.f32.mrb[2].mxu0 }
  0xdc   :  { %v2797_v23 = vadd.f32 %v2226_v22, %v2059_v18  ;;  %v159_v24 = vpop.f32.mrb[3].mxu0 }
  0xdd   :  { %v2799_v25 = vadd.f32 %v2059_v18, %v159_v24 }
  0xdf   :  { %v2229_v26 = vpop.f32.mrb[4].mxu0 }
  0xe0   :  { %v2801_v27 = vadd.f32 %v2229_v26, %v2059_v18  ;;  %v169_v28 = vpop.f32.mrb[5].mxu0 }
  0xe1   :  { %v2803_v29 = vadd.f32 %v2059_v18, %v169_v28 }
  0xe3   :  { %v2232_v30 = vpop.f32.mrb[6].mxu0 }
  0xe4   :  { %v2805_v31 = vadd.f32 %v2232_v30, %v2059_v18  ;;  %v179_v32 = vpop.f32.mrb[7].mxu0 }
  0xe5   :  { %v2807_v33 = vadd.f32 %v2059_v18, %v179_v32 }
  0xe7   :  { %v263_v35 = vpop.f32.mrb[8].mxu0 }
  0xe8   :  { %v282_v36 = vadd.f32 %v2809_v34, %v263_v35  ;;  %v2243_v37 = vpop.f32.mrb[9].mxu0  ;;  %v267_v39 = vadd.f32 %v263_v35, %v150_v38 }
  0xea   :  { %284 = vrot.lane.b32.xlu0 %v282_v36, %s2654_s2  ;;  %v2069_v40 = vmul.f32 -1.442695, %v267_v39 }
  0xec   :  { %2555 = vpow2.f32 %v2069_v40 }
  0xf6   :  { %v2556_v41 = vpop.eup %2555 }
  0xf7   :  { %v271_v42 = vadd.f32 1.0, %v2556_v41 }
  0xf9   :  { %2557 = vrcp.f32 %v271_v42 }
 0x103   :  { %v2558_v43 = vpop.eup %2557 }
 0x104   :  { %v294_v49 = vsub.f32 1.0, %v2558_v43  ;;  %v300_v51 = vmul.f32 0.0, %v2558_v43 }
 0x15c   :  { %v285_v44 = vpop.permute.xlu0 %284 }
 0x15d   :  { %v287_v45 = vmul.f32 %v2558_v43, %v285_v44 }
 0x15f   :  { %289 = vrot.lane.b32.xlu1 %v287_v45, %s2654_s2 }
 0x1d1   :  { %v290_v46 = vpop.permute.xlu1 %289 }
 0x1d2   :  { %v292_v47 = vadd.f32 %v290_v46, %v150_v38 }
 0x1d4   :  { %2559 = vtanh.f32 %v292_v47 }
 0x1de   :  { %v2560_v48 = vpop.eup %2559 }
 0x1df   :  { %296 = vrot.lane.b32.xlu1 %v2560_v48, %s2655_s3 }
 0x251   :  { %v297_v50 = vpop.permute.xlu1 %296 }
 0x252   :  { %v299_v52 = vmul.f32 %v297_v50, %v294_v49 }
 0x254   :  { %v301_v53 = vadd.f32 %v300_v51, %v299_v52 }
 0x256   :  { %303 = vrot.lane.b32.xlu0 %v301_v53, %s2655_s3 }
 0x2c8   :  { %v304_v54 = vpop.permute.xlu0 %303 }
 0x2c9   :  { %2253 = vmatmul.mubr.msk.f32.vlgmr.msra.gmra.mrb[0].mxu1 %vm193_vm3, %v304_v54 }
 0x2ca   :  { %2460 = vmatpush3.bf16.msra.mxu1 %v2736_v7  ;;  %2274 = vmatprep.mubr.msk.f32.mxu1 %vm2652_vm2, %v2653_v8 }
 0x2cb   :  { %2461 = vmatprep.subr.bf16.mxu1 %v2651_v3 }
 0x2ce   :  { %2463 = vmatpush3.bf16.msra.mxu1 %v2753_v12 }
 0x2cf   :  { %2470 = vmatprep.subr.bf16.mxu1 %v2651_v3 }
 0x39c   :  { %v373_v55 = vpop.f32.mrb[0].mxu1 }
 0x39d   :  { %v384_v56 = vadd.f32 %v373_v55, %v2809_v34  ;;  %v2254_v57 = vpop.f32.mrb[1].mxu1  ;;  %v377_v58 = vadd.f32 %v373_v55, %v2795_v20 }
 0x39f   :  { %386 = vrot.lane.b32.xlu1 %v384_v56, %s2654_s2  ;;  %v2072_v59 = vmul.f32 -1.442695, %v377_v58 }
 0x3a1   :  { %2561 = vpow2.f32 %v2072_v59 }
 0x3ab   :  { %v2562_v60 = vpop.eup %2561 }
 0x3ac   :  { %v381_v61 = vadd.f32 1.0, %v2562_v60 }
 0x3ae   :  { %2563 = vrcp.f32 %v381_v61 }
 0x3b8   :  { %v2564_v62 = vpop.eup %2563 }
 0x3b9   :  { %v396_v5 = vsub.f32 1.0, %v2564_v62  ;;  %v402_v9 = vmul.f32 %v2564_v62, %v301_v53 }
 0x411   :  { %v387_v63 = vpop.permute.xlu1 %386 }
 0x412   :  { %v389_v0 = vmul.f32 %v2564_v62, %v387_v63 }
 0x414   :  { %391 = vrot.lane.b32.xlu0 %v389_v0, %s2654_s2 }
 0x486   :  { %v392_v1 = vpop.permute.xlu0 %391 }
 0x487   :  { %v394_v2 = vadd.f32 %v392_v1, %v2795_v20 }
 0x489   :  { %2565 = vtanh.f32 %v394_v2 }
 0x493   :  { %v2566_v4 = vpop.eup %2565 }
 0x494   :  { %398 = vrot.lane.b32.xlu1 %v2566_v4, %s2655_s3 }
 0x506   :  { %v399_v6 = vpop.permute.xlu1 %398 }
 0x507   :  { %v401_v10 = vmul.f32 %v399_v6, %v396_v5 }
 0x509   :  { %v403_v11 = vadd.f32 %v402_v9, %v401_v10 }
 0x50b   :  { %405 = vrot.lane.b32.xlu0 %v403_v11, %s2655_s3 }
 0x57d   :  { %v406_v13 = vpop.permute.xlu0 %405 }
 0x57e   :  { %2264 = vmatmul.mubr.msk.f32.vlgmr.msra.gmra.mrb[10].mxu0 %vm193_vm3, %v406_v13 }
 0x57f   :  { %2466 = vmatpush3.bf16.msra.mxu0 %v2736_v7  ;;  %2285 = vmatprep.mubr.msk.f32.mxu0 %vm2652_vm2, %v2653_v8 }
 0x580   :  { %2467 = vmatprep.subr.bf16.mxu0 %v2651_v3 }
 0x583   :  { %2469 = vmatpush3.bf16.msra.mxu0 %v2753_v12 }
 0x584   :  { %2476 = vmatprep.subr.bf16.mxu0 %v2651_v3 }
 0x651   :  { %v475_v14 = vpop.f32.mrb[10].mxu0 }
 0x652   :  { %v486_v15 = vadd.f32 %v475_v14, %v2809_v34  ;;  %v2265_v16 = vpop.f32.mrb[11].mxu0  ;;  %v479_v17 = vadd.f32 %v475_v14, %v2799_v25 }
 0x654   :  { %488 = vrot.lane.b32.xlu1 %v486_v15, %s2654_s2  ;;  %v2074_v18 = vmul.f32 -1.442695, %v479_v17 }
 0x656   :  { %2567 = vpow2.f32 %v2074_v18 }
 0x660   :  { %v2568_v19 = vpop.eup %2567 }
 0x661   :  { %v483_v20 = vadd.f32 1.0, %v2568_v19 }
 0x663   :  { %2569 = vrcp.f32 %v483_v20 }
 0x66d   :  { %v2570_v21 = vpop.eup %2569 }
 0x66e   :  { %v498_v32 = vsub.f32 1.0, %v2570_v21  ;;  %v504_v36 = vmul.f32 %v2570_v21, %v403_v11 }
 0x6c6   :  { %v489_v22 = vpop.permute.xlu1 %488 }
 0x6c7   :  { %v491_v24 = vmul.f32 %v2570_v21, %v489_v22 }
 0x6c9   :  { %493 = vrot.lane.b32.xlu0 %v491_v24, %s2654_s2 }
 0x73b   :  { %v494_v26 = vpop.permute.xlu0 %493 }
 0x73c   :  { %v496_v28 = vadd.f32 %v494_v26, %v2799_v25 }
 0x73e   :  { %2571 = vtanh.f32 %v496_v28 }
 0x748   :  { %v2572_v30 = vpop.eup %2571 }
 0x749   :  { %500 = vrot.lane.b32.xlu1 %v2572_v30, %s2655_s3 }
 0x7bb   :  { %v501_v35 = vpop.permute.xlu1 %500 }
 0x7bc   :  { %v503_v37 = vmul.f32 %v501_v35, %v498_v32 }
 0x7be   :  { %v505_v38 = vadd.f32 %v504_v36, %v503_v37 }
 0x7c0   :  { %507 = vrot.lane.b32.xlu0 %v505_v38, %s2655_s3 }
 0x832   :  { %v508_v39 = vpop.permute.xlu0 %507 }
 0x833   :  { %2275 = vmatmul.mubr.msk.f32.vlgmr.msra.gmra.mrb[2].mxu1 %vm193_vm3, %v508_v39 }
 0x834   :  { %2472 = vmatpush3.bf16.msra.mxu1 %v2736_v7  ;;  %2296 = vmatprep.mubr.msk.f32.mxu1 %vm2652_vm2, %v2653_v8 }
 0x835   :  { %2473 = vmatprep.subr.bf16.mxu1 %v2651_v3 }
 0x838   :  { %2475 = vmatpush3.bf16.msra.mxu1 %v2753_v12 }
 0x839   :  { %2482 = vmatprep.subr.bf16.mxu1 %v2651_v3 }
 0x906   :  { %v577_v25 = vpop.f32.mrb[2].mxu1 }
 0x907   :  { %v588_v40 = vadd.f32 %v577_v25, %v2809_v34  ;;  %v2276_v41 = vpop.f32.mrb[3].mxu1  ;;  %v581_v42 = vadd.f32 %v577_v25, %v2797_v23 }
 0x909   :  { %590 = vrot.lane.b32.xlu1 %v588_v40, %s2654_s2  ;;  %v2076_v43 = vmul.f32 -1.442695, %v581_v42 }
 0x90b   :  { %2573 = vpow2.f32 %v2076_v43 }
 0x915   :  { %v2574_v44 = vpop.eup %2573 }
 0x916   :  { %v585_v45 = vadd.f32 1.0, %v2574_v44 }
 0x918   :  { %2575 = vrcp.f32 %v585_v45 }
 0x922   :  { %v2576_v46 = vpop.eup %2575 }
 0x923   :  { %v600_v52 = vsub.f32 1.0, %v2576_v46  ;;  %v606_v54 = vmul.f32 %v2576_v46, %v505_v38 }
 0x97b   :  { %v591_v47 = vpop.permute.xlu1 %590 }
 0x97c   :  { %v593_v48 = vmul.f32 %v2576_v46, %v591_v47 }
 0x97e   :  { %595 = vrot.lane.b32.xlu0 %v593_v48, %s2654_s2 }
 0x9f0   :  { %v596_v49 = vpop.permute.xlu0 %595 }
 0x9f1   :  { %v598_v50 = vadd.f32 %v596_v49, %v2797_v23 }
 0x9f3   :  { %2577 = vtanh.f32 %v598_v50 }
 0x9fd   :  { %v2578_v51 = vpop.eup %2577 }
 0x9fe   :  { %602 = vrot.lane.b32.xlu1 %v2578_v51, %s2655_s3 }
 0xa70   :  { %v603_v53 = vpop.permute.xlu1 %602 }
 0xa71   :  { %v605_v55 = vmul.f32 %v603_v53, %v600_v52 }
 0xa73   :  { %v607_v56 = vadd.f32 %v606_v54, %v605_v55 }
 0xa75   :  { %609 = vrot.lane.b32.xlu0 %v607_v56, %s2655_s3 }
 0xae7   :  { %v610_v57 = vpop.permute.xlu0 %609 }
 0xae8   :  { %2286 = vmatmul.mubr.msk.f32.vlgmr.msra.gmra.mrb[12].mxu0 %vm193_vm3, %v610_v57 }
 0xae9   :  { %2478 = vmatpush3.bf16.msra.mxu0 %v2736_v7  ;;  %2307 = vmatprep.mubr.msk.f32.mxu0 %vm2652_vm2, %v2653_v8 }
 0xaea   :  { %2479 = vmatprep.subr.bf16.mxu0 %v2651_v3 }
 0xaed   :  { %2481 = vmatpush3.bf16.msra.mxu0 %v2753_v12 }
 0xaee   :  { %2488 = vmatprep.subr.bf16.mxu0 %v2651_v3 }
 0xbbb   :  { %v679_v23 = vpop.f32.mrb[12].mxu0 }
 0xbbc   :  { %v690_v58 = vadd.f32 %v679_v23, %v2809_v34  ;;  %v2287_v59 = vpop.f32.mrb[13].mxu0  ;;  %v683_v60 = vadd.f32 %v679_v23, %v2803_v29 }
 0xbbe   :  { %692 = vrot.lane.b32.xlu1 %v690_v58, %s2654_s2  ;;  %v2078_v61 = vmul.f32 -1.442695, %v683_v60 }
 0xbc0   :  { %2579 = vpow2.f32 %v2078_v61 }
 0xbca   :  { %v2580_v62 = vpop.eup %2579 }
 0xbcb   :  { %v687_v63 = vadd.f32 1.0, %v2580_v62 }
 0xbcd   :  { %2581 = vrcp.f32 %v687_v63 }
 0xbd7   :  { %v2582_v0 = vpop.eup %2581 }
 0xbd8   :  { %v702_v9 = vsub.f32 1.0, %v2582_v0  ;;  %v708_v11 = vmul.f32 %v2582_v0, %v607_v56 }
 0xc30   :  { %v693_v1 = vpop.permute.xlu1 %692 }
 0xc31   :  { %v695_v2 = vmul.f32 %v2582_v0, %v693_v1 }
 0xc33   :  { %697 = vrot.lane.b32.xlu0 %v695_v2, %s2654_s2  ;;  %v1017_v2 = vld [vmem:[%s3142_s5 + $0x8] sm:$0xff] }
 0xca5   :  { %v698_v4 = vpop.permute.xlu0 %697 }
 0xca6   :  { %v700_v5 = vadd.f32 %v698_v4, %v2803_v29  ;;  %v1102_v4 = vld [vmem:[%s3143_s6] sm:$0xff] }
 0xca8   :  { %2583 = vtanh.f32 %v700_v5 }
 0xcb2   :  { %v2584_v6 = vpop.eup %2583 }
 0xcb3   :  { %704 = vrot.lane.b32.xlu1 %v2584_v6, %s2655_s3  ;;  %v1103_v6 = vld [vmem:[%s3143_s6 + $0x8] sm:$0xff] }
 0xd25   :  { %v705_v10 = vpop.permute.xlu1 %704 }
 0xd26   :  { %v707_v13 = vmul.f32 %v705_v10, %v702_v9  ;;  %v1019_v9 = vld [vmem:[%s3142_s5 + $0x18] sm:$0xff]  ;;  %v2922_v10 = vpack.c.bf16 %v1103_v6, %v1102_v4 }
 0xd28   :  { %v709_v14 = vadd.f32 %v708_v11, %v707_v13  ;;  %v1104_v11 = vld [vmem:[%s3143_s6 + $0x10] sm:$0xff]  ;;  %v1105_v13 = vld [vmem:[%s3143_s6 + $0x18] sm:$0xff] }
 0xd2a   :  { %711 = vrot.lane.b32.xlu0 %v709_v14, %s2655_s3 }
 0xd9c   :  { %v712_v15 = vpop.permute.xlu0 %711 }
 0xd9d   :  { %2297 = vmatmul.mubr.msk.f32.vlgmr.msra.gmra.mrb[4].mxu1 %vm193_vm3, %v712_v15  ;;  %v2932_v15 = vpack.c.bf16 %v1105_v13, %v1104_v11 }
 0xd9e   :  { %2484 = vmatpush3.bf16.msra.mxu1 %v2736_v7  ;;  %2318 = vmatprep.mubr.msk.f32.mxu1 %vm2652_vm2, %v2653_v8 }
 0xd9f   :  { %2485 = vmatprep.subr.bf16.mxu1 %v2651_v3 }
 0xda2   :  { %2487 = vmatpush3.bf16.msra.mxu1 %v2753_v12 }
 0xda3   :  { %2494 = vmatprep.subr.bf16.mxu1 %v2651_v3 }
 0xe70   :  { %v781_v29 = vpop.f32.mrb[4].mxu1 }
 0xe71   :  { %v792_v16 = vadd.f32 %v781_v29, %v2809_v34  ;;  %v2298_v17 = vpop.f32.mrb[5].mxu1  ;;  %v785_v18 = vadd.f32 %v781_v29, %v2801_v27 }
 0xe73   :  { %794 = vrot.lane.b32.xlu1 %v792_v16, %s2654_s2  ;;  %v2080_v19 = vmul.f32 -1.442695, %v785_v18  ;;  %v2089_v16 = vld [vmem:[%s3144_s8] ss:$0 sm:$0xff] }
 0xe75   :  { %2585 = vpow2.f32 %v2080_v19 }
 0xe7f   :  { %v2586_v7 = vpop.eup %2585 }
 0xe80   :  { %v789_v20 = vadd.f32 1.0, %v2586_v7 }
 0xe82   :  { %2587 = vrcp.f32 %v789_v20 }
 0xe8c   :  { %v2588_v21 = vpop.eup %2587 }
 0xe8d   :  { %v804_v30 = vsub.f32 1.0, %v2588_v21  ;;  %v810_v35 = vmul.f32 %v2588_v21, %v709_v14 }
 0xee5   :  { %v795_v22 = vpop.permute.xlu1 %794 }
 0xee6   :  { %v797_v24 = vmul.f32 %v2588_v21, %v795_v22 }
 0xee8   :  { %799 = vrot.lane.b32.xlu0 %v797_v24, %s2654_s2 }
 0xf5a   :  { %v800_v12 = vpop.permute.xlu0 %799 }
 0xf5b   :  { %v802_v26 = vadd.f32 %v800_v12, %v2801_v27 }
 0xf5d   :  { %2589 = vtanh.f32 %v802_v26 }
 0xf67   :  { %v2590_v28 = vpop.eup %2589 }
 0xf68   :  { %806 = vrot.lane.b32.xlu1 %v2590_v28, %s2655_s3 }
 0xfda   :  { %v807_v32 = vpop.permute.xlu1 %806 }
 0xfdb   :  { %v809_v36 = vmul.f32 %v807_v32, %v804_v30  ;;  %v2085_v32 = vld [vmem:[%s3145_s7] ss:$0 sm:$0xff] }
 0xfdd   :  { %v811_v37 = vadd.f32 %v810_v35, %v809_v36 }
 0xfdf   :  { %813 = vrot.lane.b32.xlu0 %v811_v37, %s2655_s3 }
0x1051   :  { %v814_v38 = vpop.permute.xlu0 %813 }
0x1052   :  { %2308 = vmatmul.mubr.msk.f32.vlgmr.msra.gmra.mrb[14].mxu0 %vm193_vm3, %v814_v38 }
0x1053   :  { %2329 = vmatprep.mubr.msk.f32.mxu0 %vm2652_vm2, %v2653_v8 }
0x1125   :  { %v883_v39 = vpop.f32.mrb[14].mxu0 }
0x1126   :  { %v894_v27 = vadd.f32 %v883_v39, %v2809_v34  ;;  %v2309_v25 = vpop.f32.mrb[15].mxu0  ;;  %v887_v40 = vadd.f32 %v883_v39, %v2807_v33 }
0x1128   :  { %896 = vrot.lane.b32.xlu1 %v894_v27, %s2654_s2  ;;  %v2082_v41 = vmul.f32 -1.442695, %v887_v40 }
0x112a   :  { %2591 = vpow2.f32 %v2082_v41 }
0x1134   :  { %v2592_v42 = vpop.eup %2591 }
0x1135   :  { %v891_v43 = vadd.f32 1.0, %v2592_v42 }
0x1137   :  { %2593 = vrcp.f32 %v891_v43 }
0x1141   :  { %v2594_v44 = vpop.eup %2593 }
0x1142   :  { %v906_v50 = vsub.f32 1.0, %v2594_v44  ;;  %v912_v52 = vmul.f32 %v2594_v44, %v811_v37 }
0x119a   :  { %v897_v45 = vpop.permute.xlu1 %896 }
0x119b   :  { %v899_v46 = vmul.f32 %v2594_v44, %v897_v45 }
0x119d   :  { %901 = vrot.lane.b32.xlu0 %v899_v46, %s2654_s2 }
0x120f   :  { %v902_v47 = vpop.permute.xlu0 %901 }
0x1210   :  { %v904_v48 = vadd.f32 %v902_v47, %v2807_v33 }
0x1212   :  { %2595 = vtanh.f32 %v904_v48 }
0x121c   :  { %v2596_v49 = vpop.eup %2595 }
0x121d   :  { %908 = vrot.lane.b32.xlu1 %v2596_v49, %s2655_s3 }
0x128f   :  { %v909_v51 = vpop.permute.xlu1 %908 }
0x1290   :  { %v911_v53 = vmul.f32 %v909_v51, %v906_v50 }
0x1292   :  { %v913_v54 = vadd.f32 %v912_v52, %v911_v53 }
0x1294   :  { %915 = vrot.lane.b32.xlu0 %v913_v54, %s2655_s3 }
0x1306   :  { %v916_v55 = vpop.permute.xlu0 %915 }
0x1307   :  { %2319 = vmatmul.mubr.msk.f32.vlgmr.msra.gmra.mrb[6].mxu1 %vm193_vm3, %v916_v55 }
0x1308   :  { %2340 = vmatprep.mubr.msk.f32.mxu1 %vm2652_vm2, %v2653_v8  ;;  %2496 = vmatpush3.bf16.msra.mxu1 %v2922_v10 }
0x1309   :  { %2497 = vmatprep.subr.bf16.mxu1 %v2651_v3 }
0x130c   :  { %2499 = vmatpush3.bf16.msra.mxu1 %v2932_v15 }
0x130d   :  { %2506 = vmatprep.subr.bf16.mxu1 %v2651_v3 }
0x13da   :  { %v985_v56 = vpop.f32.mrb[6].mxu1 }
0x13db   :  { %v996_v33 = vadd.f32 %v985_v56, %v2809_v34  ;;  %v2320_v57 = vpop.f32.mrb[7].mxu1  ;;  %v989_v23 = vadd.f32 %v985_v56, %v2805_v31  ;;  %v1016_v34 = vld [vmem:[%s3142_s5] sm:$0xff] }
0x13dc   :  { %v2489_v5 = vpack.c.bf16 %v1017_v2, %v1016_v34 }
0x13dd   :  { %998 = vrot.lane.b32.xlu1 %v996_v33, %s2654_s2  ;;  %v2084_v58 = vmul.f32 -1.442695, %v989_v23 }
0x13de   :  { %2490 = vmatpush3.bf16.msra.mxu0 %v2489_v5 }
0x13df   :  { %2597 = vpow2.f32 %v2084_v58  ;;  %2491 = vmatprep.subr.bf16.mxu0 %v2651_v3 }
0x13e9   :  { %v2598_v59 = vpop.eup %2597 }
0x13ea   :  { %v993_v60 = vadd.f32 1.0, %v2598_v59 }
0x13ec   :  { %2599 = vrcp.f32 %v993_v60 }
0x13f6   :  { %v2600_v61 = vpop.eup %2599 }
0x13f7   :  { %v1008_v17 = vsub.f32 1.0, %v2600_v61  ;;  %v1014_v19 = vmul.f32 %v2600_v61, %v913_v54 }
0x144f   :  { %v999_v62 = vpop.permute.xlu1 %998 }
0x1450   :  { %v1001_v63 = vmul.f32 %v2600_v61, %v999_v62 }
0x1452   :  { %1003 = vrot.lane.b32.xlu0 %v1001_v63, %s2654_s2 }
0x14c4   :  { %v1004_v0 = vpop.permute.xlu0 %1003 }
0x14c5   :  { %v1006_v1 = vadd.f32 %v1004_v0, %v2805_v31  ;;  %v1018_v31 = vld [vmem:[%s3142_s5 + $0x10] sm:$0xff] }
0x14c6   :  { %v2492_v14 = vpack.c.bf16 %v1019_v9, %v1018_v31 }
0x14c7   :  { %2601 = vtanh.f32 %v1006_v1 }
0x14c8   :  { %2493 = vmatpush3.bf16.msra.mxu0 %v2492_v14 }
0x14c9   :  { %2500 = vmatprep.subr.bf16.mxu0 %v2651_v3 }
0x14d1   :  { %v2602_v29 = vpop.eup %2601 }
0x14d2   :  { %1010 = vrot.lane.b32.xlu1 %v2602_v29, %s2655_s3 }
0x14d6   :  { %1189 = vrot.lane.b32.xlu1 %v2089_v16, %s2654_s2 }
0x1544   :  { %v1011_v18 = vpop.permute.xlu1 %1010 }
0x1545   :  { %v1013_v7 = vmul.f32 %v1011_v18, %v1008_v17 }
0x1547   :  { %v1015_v20 = vadd.f32 %v1014_v19, %v1013_v7 }
0x1548   :  { %v2958_v22 = vpop.permute.xlu1 %1189 }
0x1549   :  { %1028 = vrot.lane.b32.xlu0 %v1015_v20, %s2655_s3 }
0x15bb   :  { %v1029_v21 = vpop.permute.xlu0 %1028 }
0x15bc   :  { %2330 = vmatmul.mubr.msk.f32.vlgmr.msra.gmra.mrb[16].mxu0 %vm193_vm3, %v1029_v21  ;;  %2341 = vmatmul.mubr.msk.f32.vlgmr.msra.gmra.mrb[8].mxu1 %vm193_vm3, %v1029_v21 }
0x15bd   :  { %2502 = vmatpush3.bf16.msra.mxu0 %v2922_v10  ;;  %2351 = vmatprep.mubr.msk.f32.mxu0 %vm2652_vm2, %v2653_v8 }
0x15be   :  { %2503 = vmatprep.subr.bf16.mxu0 %v2651_v3  ;;  %2508 = vmatpush3.bf16.msra.mxu1 %v2922_v10 }
0x15bf   :  { %2509 = vmatprep.subr.bf16.mxu1 %v2651_v3  ;;  %2362 = vmatprep.mubr.msk.f32.mxu1 %vm2652_vm2, %v2653_v8 }
0x15c1   :  { %2505 = vmatpush3.bf16.msra.mxu0 %v2932_v15 }
0x15c2   :  { %2511 = vmatpush3.bf16.msra.mxu1 %v2932_v15  ;;  %2512 = vmatprep.subr.bf16.mxu0 %v2651_v3 }
0x15c3   :  { %2518 = vmatprep.subr.bf16.mxu1 %v2651_v3 }
0x168f   :  { %v1098_v24 = vpop.f32.mrb[16].mxu0  ;;  %v1173_v12 = vpop.f32.mrb[8].mxu1 }
0x1690   :  { %v1192_v26 = vadd.f32 %v2958_v22, %v1173_v12  ;;  %v2331_v28 = vpop.f32.mrb[17].mxu0  ;;  %v2342_v30 = vpop.f32.mrb[9].mxu1  ;;  %v2965_v35 = vadd.f32 %v2085_v32, %v1098_v24 }
0x1692   :  { %1194 = vrot.lane.b32.xlu0 %v1192_v26, %s2654_s2  ;;  %v1177_v36 = vadd.f32 %v1173_v12, %v2965_v35 }
0x1694   :  { %v2088_v37 = vmul.f32 -1.442695, %v1177_v36 }
0x1696   :  { %2603 = vpow2.f32 %v2088_v37 }
0x16a0   :  { %v2604_v38 = vpop.eup %2603 }
0x16a1   :  { %v1181_v39 = vadd.f32 1.0, %v2604_v38 }
0x16a3   :  { %2605 = vrcp.f32 %v1181_v39 }
0x16ad   :  { %v2606_v27 = vpop.eup %2605 }
0x16ae   :  { %v1204_v44 = vsub.f32 1.0, %v2606_v27  ;;  %v1210_v46 = vmul.f32 %v2606_v27, %v1015_v20 }
0x1704   :  { %v1195_v25 = vpop.permute.xlu0 %1194 }
0x1705   :  { %v1197_v40 = vmul.f32 %v2606_v27, %v1195_v25 }
0x1707   :  { %1199 = vrot.lane.b32.xlu1 %v1197_v40, %s2654_s2 }
0x1779   :  { %v1200_v41 = vpop.permute.xlu1 %1199 }
0x177a   :  { %v1202_v42 = vadd.f32 %v1200_v41, %v2965_v35 }
0x177c   :  { %2607 = vtanh.f32 %v1202_v42 }
0x1786   :  { %v2608_v43 = vpop.eup %2607 }
0x1787   :  { %1206 = vrot.lane.b32.xlu0 %v2608_v43, %s2655_s3 }
0x17f9   :  { %v1207_v45 = vpop.permute.xlu0 %1206 }
0x17fa   :  { %v1209_v47 = vmul.f32 %v1207_v45, %v1204_v44 }
0x17fc   :  { %v1211_v48 = vadd.f32 %v1210_v46, %v1209_v47 }
0x17fe   :  { %1213 = vrot.lane.b32.xlu1 %v1211_v48, %s2655_s3 }
0x1870   :  { %v2972_v49 = vpop.permute.xlu1 %1213 }
0x1871   :  { %2352 = vmatmul.mubr.msk.f32.vlgmr.msra.gmra.mrb[18].mxu0 %vm193_vm3, %v2972_v49 }
0x1872   :  { %2514 = vmatpush3.bf16.msra.mxu0 %v2922_v10  ;;  %2373 = vmatprep.mubr.msk.f32.mxu0 %vm2652_vm2, %v2653_v8 }
0x1873   :  { %2515 = vmatprep.subr.bf16.mxu0 %v2651_v3 }
0x1876   :  { %2517 = vmatpush3.bf16.msra.mxu0 %v2932_v15 }
0x1877   :  { %2524 = vmatprep.subr.bf16.mxu0 %v2651_v3 }
0x1944   :  { %v1283_v50 = vpop.f32.mrb[18].mxu0 }
0x1945   :  { %v1294_v51 = vadd.f32 %v1283_v50, %v2958_v22  ;;  %v2353_v52 = vpop.f32.mrb[19].mxu0  ;;  %v1287_v53 = vadd.f32 %v1283_v50, %v2965_v35 }
0x1947   :  { %1296 = vrot.lane.b32.xlu0 %v1294_v51, %s2654_s2  ;;  %v2091_v54 = vmul.f32 -1.442695, %v1287_v53 }
0x1949   :  { %2609 = vpow2.f32 %v2091_v54 }
0x1953   :  { %v2610_v55 = vpop.eup %2609 }
0x1954   :  { %v1291_v56 = vadd.f32 1.0, %v2610_v55 }
0x1956   :  { %2611 = vrcp.f32 %v1291_v56 }
0x1960   :  { %v2612_v33 = vpop.eup %2611 }
0x1961   :  { %v1306_v61 = vsub.f32 1.0, %v2612_v33  ;;  %v1312_v63 = vmul.f32 %v2612_v33, %v1211_v48 }
0x19b9   :  { %v1297_v57 = vpop.permute.xlu0 %1296 }
0x19ba   :  { %v1299_v23 = vmul.f32 %v2612_v33, %v1297_v57 }
0x19bc   :  { %1301 = vrot.lane.b32.xlu1 %v1299_v23, %s2654_s2 }
0x1a2e   :  { %v1302_v58 = vpop.permute.xlu1 %1301 }
0x1a2f   :  { %v1304_v59 = vadd.f32 %v1302_v58, %v2965_v35 }
0x1a31   :  { %2613 = vtanh.f32 %v1304_v59 }
0x1a3b   :  { %v2614_v60 = vpop.eup %2613 }
0x1a3c   :  { %1308 = vrot.lane.b32.xlu0 %v2614_v60, %s2655_s3 }
0x1aae   :  { %v1309_v62 = vpop.permute.xlu0 %1308 }
0x1aaf   :  { %v1311_v0 = vmul.f32 %v1309_v62, %v1306_v61 }
0x1ab1   :  { %v1313_v1 = vadd.f32 %v1312_v63, %v1311_v0 }
0x1ab3   :  { %1315 = vrot.lane.b32.xlu1 %v1313_v1, %s2655_s3 }
0x1b25   :  { %v2989_v34 = vpop.permute.xlu1 %1315 }
0x1b26   :  { %2363 = vmatmul.mubr.msk.f32.vlgmr.msra.gmra.mrb[10].mxu1 %vm193_vm3, %v2989_v34 }
0x1b27   :  { %2520 = vmatpush3.bf16.msra.mxu1 %v2922_v10  ;;  %2384 = vmatprep.mubr.msk.f32.mxu1 %vm2652_vm2, %v2653_v8 }
0x1b28   :  { %2521 = vmatprep.subr.bf16.mxu1 %v2651_v3 }
0x1b2b   :  { %2523 = vmatpush3.bf16.msra.mxu1 %v2932_v15 }
0x1b2c   :  { %2530 = vmatprep.subr.bf16.mxu1 %v2651_v3 }
0x1bf9   :  { %v1385_v2 = vpop.f32.mrb[10].mxu1 }
0x1bfa   :  { %v1396_v4 = vadd.f32 %v1385_v2, %v2958_v22  ;;  %v2364_v5 = vpop.f32.mrb[11].mxu1  ;;  %v1389_v6 = vadd.f32 %v1385_v2, %v2965_v35 }
0x1bfc   :  { %1398 = vrot.lane.b32.xlu0 %v1396_v4, %s2654_s2  ;;  %v2093_v31 = vmul.f32 -1.442695, %v1389_v6 }
0x1bfe   :  { %2615 = vpow2.f32 %v2093_v31 }
0x1c08   :  { %v2616_v9 = vpop.eup %2615 }
0x1c09   :  { %v1393_v11 = vadd.f32 1.0, %v2616_v9 }
0x1c0b   :  { %2617 = vrcp.f32 %v1393_v11 }
0x1c15   :  { %v2618_v13 = vpop.eup %2617 }
0x1c16   :  { %v1408_v19 = vsub.f32 1.0, %v2618_v13  ;;  %v1414_v20 = vmul.f32 %v2618_v13, %v1313_v1 }
0x1c6e   :  { %v1399_v14 = vpop.permute.xlu0 %1398 }
0x1c6f   :  { %v1401_v29 = vmul.f32 %v2618_v13, %v1399_v14 }
0x1c71   :  { %1403 = vrot.lane.b32.xlu1 %v1401_v29, %s2654_s2  ;;  %v1926_v29 = vld [vmem:[%s3146_s9] sm:$0xff] }
0x1ce3   :  { %v1404_v16 = vpop.permute.xlu1 %1403 }
0x1ce4   :  { %v1406_v17 = vadd.f32 %v1404_v16, %v2965_v35  ;;  %v1927_v16 = vld [vmem:[%s3146_s9 + $0x8] sm:$0xff] }
0x1ce6   :  { %2619 = vtanh.f32 %v1406_v17  ;;  %v2542_v17 = vpack.c.bf16 %v1927_v16, %v1926_v29 }
0x1cf0   :  { %v2620_v18 = vpop.eup %2619 }
0x1cf1   :  { %1410 = vrot.lane.b32.xlu0 %v2620_v18, %s2655_s3 }
0x1d63   :  { %v1411_v7 = vpop.permute.xlu0 %1410 }
0x1d64   :  { %v1413_v21 = vmul.f32 %v1411_v7, %v1408_v19 }
0x1d66   :  { %v1415_v24 = vadd.f32 %v1414_v20, %v1413_v21 }
0x1d68   :  { %1417 = vrot.lane.b32.xlu1 %v1415_v24, %s2655_s3 }
0x1dda   :  { %v3006_v12 = vpop.permute.xlu1 %1417 }
0x1ddb   :  { %2374 = vmatmul.mubr.msk.f32.vlgmr.msra.gmra.mrb[20].mxu0 %vm193_vm3, %v3006_v12 }
0x1ddc   :  { %2526 = vmatpush3.bf16.msra.mxu0 %v2922_v10  ;;  %2395 = vmatprep.mubr.msk.f32.mxu0 %vm2652_vm2, %v2653_v8 }
0x1ddd   :  { %2527 = vmatprep.subr.bf16.mxu0 %v2651_v3 }
0x1de0   :  { %2529 = vmatpush3.bf16.msra.mxu0 %v2932_v15 }
0x1de1   :  { %2536 = vmatprep.subr.bf16.mxu0 %v2651_v3 }
0x1eae   :  { %v1487_v26 = vpop.f32.mrb[20].mxu0 }
0x1eaf   :  { %v1498_v28 = vadd.f32 %v1487_v26, %v2958_v22  ;;  %v2375_v30 = vpop.f32.mrb[21].mxu0  ;;  %v1491_v32 = vadd.f32 %v1487_v26, %v2965_v35  ;;  %v1928_v26 = vld [vmem:[%s3146_s9 + $0x10] sm:$0xff] }
0x1eb1   :  { %1500 = vrot.lane.b32.xlu0 %v1498_v28, %s2654_s2  ;;  %v2095_v36 = vmul.f32 -1.442695, %v1491_v32  ;;  %v1929_v28 = vld [vmem:[%s3146_s9 + $0x18] sm:$0xff] }
0x1eb2   :  { %v2546_v30 = vpack.c.bf16 %v1929_v28, %v1928_v26 }
0x1eb3   :  { %2621 = vpow2.f32 %v2095_v36 }
0x1ebd   :  { %v2622_v37 = vpop.eup %2621 }
0x1ebe   :  { %v1495_v38 = vadd.f32 1.0, %v2622_v37 }
0x1ec0   :  { %2623 = vrcp.f32 %v1495_v38 }
0x1eca   :  { %v2624_v39 = vpop.eup %2623 }
0x1ecb   :  { %v1510_v43 = vsub.f32 1.0, %v2624_v39  ;;  %v1516_v45 = vmul.f32 %v2624_v39, %v1415_v24 }
0x1f23   :  { %v1501_v27 = vpop.permute.xlu0 %1500 }
0x1f24   :  { %v1503_v25 = vmul.f32 %v2624_v39, %v1501_v27 }
0x1f26   :  { %1505 = vrot.lane.b32.xlu1 %v1503_v25, %s2654_s2 }
0x1f98   :  { %v1506_v40 = vpop.permute.xlu1 %1505 }
0x1f99   :  { %v1508_v41 = vadd.f32 %v1506_v40, %v2965_v35 }
0x1f9b   :  { %2625 = vtanh.f32 %v1508_v41 }
0x1fa5   :  { %v2626_v42 = vpop.eup %2625 }
0x1fa6   :  { %1512 = vrot.lane.b32.xlu0 %v2626_v42, %s2655_s3 }
0x2018   :  { %v1513_v44 = vpop.permute.xlu0 %1512 }
0x2019   :  { %v1515_v46 = vmul.f32 %v1513_v44, %v1510_v43 }
0x201b   :  { %v1517_v47 = vadd.f32 %v1516_v45, %v1515_v46 }
0x201d   :  { %1519 = vrot.lane.b32.xlu1 %v1517_v47, %s2655_s3 }
0x208f   :  { %v3023_v48 = vpop.permute.xlu1 %1519 }
0x2090   :  { %2385 = vmatmul.mubr.msk.f32.vlgmr.msra.gmra.mrb[12].mxu1 %vm193_vm3, %v3023_v48 }
0x2091   :  { %2532 = vmatpush3.bf16.msra.mxu1 %v2922_v10  ;;  %2406 = vmatprep.mubr.msk.f32.mxu1 %vm2652_vm2, %v2653_v8 }
0x2092   :  { %2533 = vmatprep.subr.bf16.mxu1 %v2651_v3 }
0x2095   :  { %2535 = vmatpush3.bf16.msra.mxu1 %v2932_v15 }
0x2096   :  { %2543 = vmatprep.subr.bf16.mxu1 %v2542_v17 }
0x2163   :  { %v1589_v50 = vpop.f32.mrb[12].mxu1 }
0x2164   :  { %v1600_v51 = vadd.f32 %v1589_v50, %v2958_v22  ;;  %v2386_v52 = vpop.f32.mrb[13].mxu1  ;;  %v1593_v53 = vadd.f32 %v1589_v50, %v2965_v35 }
0x2166   :  { %1602 = vrot.lane.b32.xlu0 %v1600_v51, %s2654_s2  ;;  %v2097_v54 = vmul.f32 -1.442695, %v1593_v53 }
0x2168   :  { %2627 = vpow2.f32 %v2097_v54 }
0x2172   :  { %v2628_v55 = vpop.eup %2627 }
0x2173   :  { %v1597_v56 = vadd.f32 1.0, %v2628_v55 }
0x2175   :  { %2629 = vrcp.f32 %v1597_v56 }
0x217f   :  { %v2630_v33 = vpop.eup %2629 }
0x2180   :  { %v1612_v61 = vsub.f32 1.0, %v2630_v33  ;;  %v1618_v63 = vmul.f32 %v2630_v33, %v1517_v47 }
0x21d8   :  { %v1603_v57 = vpop.permute.xlu0 %1602 }
0x21d9   :  { %v1605_v23 = vmul.f32 %v2630_v33, %v1603_v57 }
0x21db   :  { %1607 = vrot.lane.b32.xlu1 %v1605_v23, %s2654_s2 }
0x224d   :  { %v1608_v58 = vpop.permute.xlu1 %1607 }
0x224e   :  { %v1610_v59 = vadd.f32 %v1608_v58, %v2965_v35 }
0x2250   :  { %2631 = vtanh.f32 %v1610_v59 }
0x225a   :  { %v2632_v60 = vpop.eup %2631 }
0x225b   :  { %1614 = vrot.lane.b32.xlu0 %v2632_v60, %s2655_s3 }
0x22cd   :  { %v1615_v62 = vpop.permute.xlu0 %1614 }
0x22ce   :  { %v1617_v0 = vmul.f32 %v1615_v62, %v1612_v61 }
0x22d0   :  { %v1619_v1 = vadd.f32 %v1618_v63, %v1617_v0 }
0x22d2   :  { %1621 = vrot.lane.b32.xlu1 %v1619_v1, %s2655_s3 }
0x2344   :  { %v1622_v2 = vpop.permute.xlu1 %1621 }
0x2345   :  { %2396 = vmatmul.mubr.msk.f32.vlgmr.msra.gmra.mrb[22].mxu0 %vm193_vm3, %v1622_v2 }
0x2346   :  { %2538 = vmatpush3.bf16.msra.mxu0 %v2922_v10  ;;  %2417 = vmatprep.mubr.msk.f32.mxu0 %vm2652_vm2, %v2653_v8 }
0x2347   :  { %2539 = vmatprep.subr.bf16.mxu0 %v2651_v3 }
0x234a   :  { %2541 = vmatpush3.bf16.msra.mxu0 %v2932_v15 }
0x2418   :  { %v1691_v4 = vpop.f32.mrb[22].mxu0 }
0x2419   :  { %v1702_v5 = vadd.f32 %v1691_v4, %v2958_v22  ;;  %v2397_v6 = vpop.f32.mrb[23].mxu0  ;;  %v1695_v31 = vadd.f32 %v1691_v4, %v2965_v35 }
0x241b   :  { %1704 = vrot.lane.b32.xlu0 %v1702_v5, %s2654_s2  ;;  %v2099_v9 = vmul.f32 -1.442695, %v1695_v31 }
0x241d   :  { %2633 = vpow2.f32 %v2099_v9 }
0x2427   :  { %v2634_v11 = vpop.eup %2633 }
0x2428   :  { %v1699_v13 = vadd.f32 1.0, %v2634_v11 }
0x242a   :  { %2635 = vrcp.f32 %v1699_v13 }
0x2434   :  { %v2636_v10 = vpop.eup %2635 }
0x2435   :  { %v1714_v19 = vsub.f32 1.0, %v2636_v10  ;;  %v1720_v20 = vmul.f32 %v2636_v10, %v1619_v1 }
0x248d   :  { %v1705_v14 = vpop.permute.xlu0 %1704 }
0x248e   :  { %v1707_v8 = vmul.f32 %v2636_v10, %v1705_v14 }
0x2490   :  { %1709 = vrot.lane.b32.xlu1 %v1707_v8, %s2654_s2 }
0x2502   :  { %v1710_v3 = vpop.permute.xlu1 %1709 }
0x2503   :  { %v1712_v15 = vadd.f32 %v1710_v3, %v2965_v35 }
0x2505   :  { %2637 = vtanh.f32 %v1712_v15 }
0x250f   :  { %v2638_v18 = vpop.eup %2637 }
0x2510   :  { %1716 = vrot.lane.b32.xlu0 %v2638_v18, %s2655_s3 }
0x2582   :  { %v1717_v7 = vpop.permute.xlu0 %1716 }
0x2583   :  { %v1719_v21 = vmul.f32 %v1717_v7, %v1714_v19 }
0x2585   :  { %v1721_v24 = vadd.f32 %v1720_v20, %v1719_v21 }
0x2587   :  { %1723 = vrot.lane.b32.xlu1 %v1721_v24, %s2655_s3 }
0x25f9   :  { %v1724_v32 = vpop.permute.xlu1 %1723 }
0x25fa   :  { %2407 = vmatmul.mubr.msk.f32.vlgmr.msra.gmra.mrb[14].mxu1 %vm193_vm3, %v1724_v32 }
0x25fb   :  { %2545 = vmatpush3.bf16.msra.mxu1 %v2542_v17  ;;  %2428 = vmatprep.mubr.msk.f32.mxu1 %vm193_vm3, %v2972_v49  ;;  %v3080_v49 = vld [vmem:[%s3147_s10] ss:$0 sm:$0xff] }
0x25fc   :  { %2547 = vmatprep.subr.bf16.mxu1 %v2546_v30 }
0x25ff   :  { %2549 = vmatpush3.bf16.msra.mxu1 %v2546_v30 }
0x2602   :  { %2429 = vmatmul.mubr.msk.f32.vlgmr.msra.gmra.mrb[16].mxu1 %vm193_vm3, %v2989_v34 }
0x2603   :  { %2431 = vmatprep.mubr.msk.f32.mxu1 %vm193_vm3, %v3006_v12 }
0x2606   :  { %2432 = vmatmul.mubr.msk.f32.gmra.mrb[18].mxu1 %vm193_vm3, %v3023_v48 }
0x2607   :  { %2434 = vmatprep.mubr.msk.f32.mxu1 %vm193_vm3, %v1622_v2 }
0x260a   :  { %2435 = vmatmul.mubr.msk.f32.gmra.mrb[20].mxu1 %vm193_vm3, %v1724_v32 }
0x26cd   :  { %v1793_v36 = vpop.f32.mrb[14].mxu1 }
0x26ce   :  { %v1804_v37 = vadd.f32 %v1793_v36, %v2958_v22  ;;  %v2408_v38 = vpop.f32.mrb[15].mxu1  ;;  %v1797_v47 = vadd.f32 %v1793_v36, %v2965_v35 }
0x26d0   :  { %1806 = vrot.lane.b32.xlu0 %v1804_v37, %s2654_s2  ;;  %v2101_v48 = vmul.f32 -1.442695, %v1797_v47 }
0x26d2   :  { %2639 = vpow2.f32 %v2101_v48 }
0x26d5   :  { %v2430_v34 = vpop.f32.mrb[16].mxu1 }
0x26d6   :  { %v2014_v12 = vadd.f32 %v2430_v34, %v3080_v49  ;;  %v2008_v39 = vpop.f32.mrb[17].mxu1 }
0x26d7   :  { %v2009_v27 = vadd.f32 %v3080_v49, %v2008_v39 }
0x26d8   :  { %2048 = vst.msk [vmem:[%s3148_s11 + $0x8] sm:$0xff] %vm54_vm1, %v2014_v12 }
0x26d9   :  { %2047 = vst.msk [vmem:[%s3148_s11] sm:$0xff] %vm54_vm1, %v2009_v27  ;;  %v2433_v25 = vpop.f32.mrb[18].mxu1 }
0x26da   :  { %v2024_v40 = vadd.f32 %v2433_v25, %v3080_v49  ;;  %v2018_v41 = vpop.f32.mrb[19].mxu1 }
0x26db   :  { %v2019_v42 = vadd.f32 %v3080_v49, %v2018_v41 }
0x26dc   :  { %2050 = vst.msk [vmem:[%s3148_s11 + $0x18] sm:$0xff] %vm54_vm1, %v2024_v40  ;;  %v2640_v50 = vpop.eup %2639 }
0x26dd   :  { %2049 = vst.msk [vmem:[%s3148_s11 + $0x10] sm:$0xff] %vm54_vm1, %v2019_v42  ;;  %v2436_v43 = vpop.f32.mrb[20].mxu1  ;;  %v1801_v51 = vadd.f32 1.0, %v2640_v50 }
0x26de   :  { %v2034_v44 = vadd.f32 %v2436_v43, %v3080_v49  ;;  %v2028_v45 = vpop.f32.mrb[21].mxu1 }
0x26df   :  { %v2029_v46 = vadd.f32 %v3080_v49, %v2028_v45  ;;  %2641 = vrcp.f32 %v1801_v51 }
0x26e0   :  { %2052 = vst.msk [vmem:[%s3148_s11 + $0x28] sm:$0xff] %vm54_vm1, %v2034_v44 }
0x26e1   :  { %2051 = vst.msk [vmem:[%s3148_s11 + $0x20] sm:$0xff] %vm54_vm1, %v2029_v46 }
0x26e9   :  { %v2642_v52 = vpop.eup %2641 }
0x26ea   :  { %v1816_v57 = vsub.f32 1.0, %v2642_v52  ;;  %v1822_v58 = vmul.f32 %v2642_v52, %v1721_v24 }
0x2742   :  { %v1807_v53 = vpop.permute.xlu0 %1806 }
0x2743   :  { %v1809_v54 = vmul.f32 %v2642_v52, %v1807_v53 }
0x2745   :  { %1811 = vrot.lane.b32.xlu1 %v1809_v54, %s2654_s2 }
0x27b7   :  { %v1812_v55 = vpop.permute.xlu1 %1811 }
0x27b8   :  { %v1814_v56 = vadd.f32 %v1812_v55, %v2965_v35 }
0x27ba   :  { %2643 = vtanh.f32 %v1814_v56 }
0x27c4   :  { %v2644_v33 = vpop.eup %2643 }
0x27c5   :  { %1818 = vrot.lane.b32.xlu0 %v2644_v33, %s2655_s3 }
0x2837   :  { %v1819_v23 = vpop.permute.xlu0 %1818 }
0x2838   :  { %v1821_v59 = vmul.f32 %v1819_v23, %v1816_v57 }
0x283a   :  { %v1823_v60 = vadd.f32 %v1822_v58, %v1821_v59 }
0x283c   :  { %1825 = vrot.lane.b32.xlu1 %v1823_v60, %s2655_s3 }
0x28ae   :  { %v1826_v61 = vpop.permute.xlu1 %1825 }
0x28af   :  { %2418 = vmatmul.mubr.msk.f32.vlgmr.msra.gmra.mrb[24].mxu0 %vm193_vm3, %v1826_v61  ;;  %2437 = vmatprep.mubr.msk.f32.mxu1 %vm193_vm3, %v1826_v61 }
0x2982   :  { %v1895_v62 = vpop.f32.mrb[24].mxu0 }
0x2983   :  { %v1906_v63 = vadd.f32 %v1895_v62, %v2958_v22  ;;  %v2419_v0 = vpop.f32.mrb[25].mxu0  ;;  %v1899_v1 = vadd.f32 %v1895_v62, %v2965_v35 }
0x2985   :  { %1908 = vrot.lane.b32.xlu0 %v1906_v63, %s2654_s2  ;;  %v2103_v2 = vmul.f32 -1.442695, %v1899_v1 }
0x2987   :  { %2645 = vpow2.f32 %v2103_v2 }
0x2991   :  { %v2646_v4 = vpop.eup %2645 }
0x2992   :  { %v1903_v5 = vadd.f32 1.0, %v2646_v4 }
0x2994   :  { %2647 = vrcp.f32 %v1903_v5 }
0x299e   :  { %v2648_v6 = vpop.eup %2647 }
0x299f   :  { %v1918_v10 = vsub.f32 1.0, %v2648_v6  ;;  %v1924_v8 = vmul.f32 %v2648_v6, %v1823_v60 }
0x29f7   :  { %v1909_v31 = vpop.permute.xlu0 %1908 }
0x29f8   :  { %v1911_v9 = vmul.f32 %v2648_v6, %v1909_v31 }
0x29fa   :  { %1913 = vrot.lane.b32.xlu1 %v1911_v9, %s2654_s2 }
0x2a6c   :  { %v1914_v11 = vpop.permute.xlu1 %1913 }
0x2a6d   :  { %v1916_v13 = vadd.f32 %v1914_v11, %v2965_v35 }
0x2a6f   :  { %2649 = vtanh.f32 %v1916_v13 }
0x2a79   :  { %v2650_v22 = vpop.eup %2649 }
0x2a7a   :  { %1920 = vrot.lane.b32.xlu0 %v2650_v22, %s2655_s3 }
0x2aec   :  { %v1921_v14 = vpop.permute.xlu0 %1920 }
0x2aed   :  { %v1923_v3 = vmul.f32 %v1921_v14, %v1918_v10 }
0x2aef   :  { %v1925_v15 = vadd.f32 %v1924_v8, %v1923_v3 }
0x2af1   :  { %1938 = vrot.lane.b32.xlu1 %v1925_v15, %s2655_s3 }
0x2b63   :  { %v1939_v29 = vpop.permute.xlu1 %1938 }
0x2b64   :  { %2438 = vmatmul.mubr.msk.f32.gmra.mrb[22].mxu1 %vm193_vm3, %v1939_v29 }
0x2c37   :  { %v2439_v16 = vpop.f32.mrb[22].mxu1 }
0x2c38   :  { %v2044_v17 = vadd.f32 %v2439_v16, %v3080_v49  ;;  %v2038_v18 = vpop.f32.mrb[23].mxu1 }
0x2c39   :  { %v2039_v35 = vadd.f32 %v3080_v49, %v2038_v18 }
0x2c3a   :  { %2054 = vst.msk [vmem:[%s3148_s11 + $0x38] sm:$0xff] %vm54_vm1, %v2044_v17 }
0x2c3b   :  { %2053 = vst.msk [vmem:[%s3148_s11 + $0x30] sm:$0xff] %vm54_vm1, %v2039_v35 }

</bundles_post_ra>
